<compile_context>
chip_gen: v7x
topology: tpu7x:2x2x1
jax: 0.10.0
libtpu: 0.0.40
codegen_flags: <defaults>
</compile_context>

<pallas_src>
import functools

import jax
import jax.numpy as jnp
from jax.experimental import pallas as pl
from jax.experimental.pallas import tpu as pltpu

# ---------------- small, TPU-friendly config ----------------
CAD      = 128    # cross_attention_dim
CLIP_DIM = 256    # clip_embeddings_dim
TOKENS   = 4      # clip_extra_context_tokens
BATCH    = 2
LN_EPS   = 1e-5   # torch.nn.LayerNorm default eps


# ================= fused Pallas kernel =================

def _image_proj_kernel(x_ref, w_ref, side_ref, o_ref, *, tokens, cad, eps):
    """x:(B,K) bf16   w:(K,N) bf16   side:(3,N) f32 [bias; gamma_tiled; beta_tiled]
       -> o:(B,N) where N = tokens*cad, LayerNorm applied per cad-wide token."""
    n = tokens * cad

    # Projection on the MXU: bf16 inputs, f32 accumulation.
    h = jnp.dot(x_ref[...], w_ref[...], preferred_element_type=jnp.float32)  # (B, N)

    side = side_ref[...]                 # (3, N) f32
    h = h + side[0:1, :]                 # + proj bias
    gamma = side[1:2, :]                 # LN gamma, tiled to (1, N)
    beta = side[2:3, :]                  # LN beta,  tiled to (1, N)

    # 0/1 block-diagonal selectors built from 2-D iotas (no reshape / transpose
    # / integer-div needed): `sel` (N, T) reduces lane groups -> per-token
    # stats; `sel_t` (T, N) broadcasts them back to full lane width.
    row = jax.lax.broadcasted_iota(jnp.int32, (n, tokens), 0)
    tok = jax.lax.broadcasted_iota(jnp.int32, (n, tokens), 1) * cad
    sel = jnp.logical_and(row >= tok, row < tok + cad).astype(jnp.float32)       # (N, T)

    col = jax.lax.broadcasted_iota(jnp.int32, (tokens, n), 1)
    tok_t = jax.lax.broadcasted_iota(jnp.int32, (tokens, n), 0) * cad
    sel_t = jnp.logical_and(col >= tok_t, col < tok_t + cad).astype(jnp.float32)  # (T, N)

    # Segmented (per-token) LayerNorm, fully vectorized and kept in f32.
    inv_c = jnp.float32(1.0 / cad)
    mu_t = jnp.dot(h, sel, preferred_element_type=jnp.float32) * inv_c        # (B, T)
    mu = jnp.dot(mu_t, sel_t, preferred_element_type=jnp.float32)             # (B, N)
    d = h - mu
    var_t = jnp.dot(d * d, sel, preferred_element_type=jnp.float32) * inv_c   # (B, T)
    var = jnp.dot(var_t, sel_t, preferred_element_type=jnp.float32)           # (B, N)

    y = d * jax.lax.rsqrt(var + eps)
    # Single lane-dense (N = 4*128) full-block store.
    o_ref[...] = (y * gamma + beta).astype(o_ref.dtype)


def image_proj_forward(params, image_embeds):
    """ImageProjModel.forward: (B, clip_dim) -> (B, tokens, cad)."""
    B, clip_dim = image_embeds.shape
    N = TOKENS * CAD

    # bf16 matmul operands (native MXU path, half the weight DMA);
    # accumulation and the LN epilogue stay f32 inside the kernel.
    x_bf16 = image_embeds.astype(jnp.bfloat16)
    w_bf16 = params["proj_w"].astype(jnp.bfloat16)

    # Pack bias + pre-tiled gamma/beta into one (3, N) f32 side input (1 DMA).
    side = jnp.concatenate(
        [params["proj_b"].reshape(1, N),
         jnp.tile(params["ln_g"].reshape(1, CAD), (1, TOKENS)),
         jnp.tile(params["ln_b"].reshape(1, CAD), (1, TOKENS))],
        axis=0).astype(jnp.float32)

    vmem = pl.BlockSpec(memory_space=pltpu.MemorySpace.VMEM)
    out2d = pl.pallas_call(
        functools.partial(_image_proj_kernel, tokens=TOKENS, cad=CAD, eps=LN_EPS),
        out_shape=jax.ShapeDtypeStruct((B, N), image_embeds.dtype),
        in_specs=[vmem, vmem, vmem],     # full-block, single-buffered, no grid
        out_specs=vmem,
    )(x_bf16, w_bf16, side)

    # Row-major contiguous split of the last axis: metadata-only reshape.
    return out2d.reshape(B, TOKENS, CAD)


# ================= deterministic params & reference =================

def init_params(key):
    k1, k2, k3, k4 = jax.random.split(key, 4)
    return {
        "proj_w": 0.02 * jax.random.normal(k1, (CLIP_DIM, TOKENS * CAD), jnp.float32),
        "proj_b": 0.02 * jax.random.normal(k2, (TOKENS * CAD,), jnp.float32),
        "ln_g": 1.0 + 0.05 * jax.random.normal(k3, (CAD,), jnp.float32),
        "ln_b": 0.05 * jax.random.normal(k4, (CAD,), jnp.float32),
    }


def reference_forward(params, image_embeds, *, bf16_inputs):
    """Pure-JAX ImageProjModel.forward.  With bf16_inputs=True the matmul
    operands are quantized exactly like the kernel's (f32 math otherwise)."""
    x = image_embeds
    w = params["proj_w"]
    if bf16_inputs:
        x = x.astype(jnp.bfloat16).astype(jnp.float32)
        w = w.astype(jnp.bfloat16).astype(jnp.float32)
    h = x @ w + params["proj_b"]
    h = h.reshape(-1, TOKENS, CAD)
    mu = jnp.mean(h, axis=-1, keepdims=True)
    var = jnp.mean(jnp.square(h - mu), axis=-1, keepdims=True)
    y = (h - mu) * jax.lax.rsqrt(var + LN_EPS)
    return y * params["ln_g"] + params["ln_b"]


# ================= main =================

if __name__ == "__main__":
    key = jax.random.PRNGKey(0)
    kp, kx = jax.random.split(key)
    params = init_params(kp)
    image_embeds = jax.random.normal(kx, (BATCH, CLIP_DIM), jnp.float32)

    fwd = jax.jit(image_proj_forward)
    out = jax.block_until_ready(fwd(params, image_embeds))

    assert out.shape == (BATCH, TOKENS, CAD), out.shape
    assert bool(jnp.all(jnp.isfinite(out)))

    # Tight check vs. a reference using the same bf16-quantized matmul inputs.
    ref_matched = reference_forward(params, image_embeds, bf16_inputs=True)
    assert bool(jnp.allclose(out, ref_matched, atol=2e-2, rtol=2e-2))

    # Looser sanity check vs. the pure-f32 module semantics.
    ref_f32 = reference_forward(params, image_embeds, bf16_inputs=False)
    assert bool(jnp.allclose(out, ref_f32, atol=1e-1, rtol=1e-1))

    print("KERNEL_OK")
</pallas_src>

<mosaic_0001>
module attributes {stable_mosaic.version = 11 : i64} {
  func.func @_image_proj_kernel(%arg0: memref<2x256xbf16, #tpu.memory_space<vmem>>, %arg1: memref<256x512xbf16, #tpu.memory_space<vmem>>, %arg2: memref<3x512xf32, #tpu.memory_space<vmem>>, %arg3: memref<2x512xf32, #tpu.memory_space<vmem>>) attributes {dimension_semantics = [], scalar_prefetch = 0 : i64, scratch_operands = 0 : i64, tpu.core_type = #tpu.core_type<tc>} {
    %c0 = arith.constant 0 : index
    %c0_0 = arith.constant 0 : index
    %0 = vector.load %arg0[%c0, %c0_0] : memref<2x256xbf16, #tpu.memory_space<vmem>>, vector<2x256xbf16>
    %c0_1 = arith.constant 0 : index
    %c0_2 = arith.constant 0 : index
    %1 = vector.load %arg1[%c0_1, %c0_2] : memref<256x512xbf16, #tpu.memory_space<vmem>>, vector<256x512xbf16>
    %cst = arith.constant dense<0.000000e+00> : vector<2x512xf32>
    %2 = tpu.matmul %0, %1, %cst {dimension_numbers = #tpu.dot_dimension_numbers<[1], [0], [0], [1], [0, 0, 1, 1], [], []>} : vector<2x256xbf16>, vector<256x512xbf16>, vector<2x512xf32> -> vector<2x512xf32>
    %c0_3 = arith.constant 0 : index
    %c0_4 = arith.constant 0 : index
    %3 = vector.load %arg2[%c0_3, %c0_4] : memref<3x512xf32, #tpu.memory_space<vmem>>, vector<3x512xf32>
    %4 = vector.extract_strided_slice %3 {offsets = [0, 0], sizes = [1, 512], strides = [1, 1]} : vector<3x512xf32> to vector<1x512xf32>
    %5 = vector.broadcast %4 : vector<1x512xf32> to vector<2x512xf32>
    %6 = arith.addf %2, %5 : vector<2x512xf32>
    %7 = vector.extract_strided_slice %3 {offsets = [1, 0], sizes = [1, 512], strides = [1, 1]} : vector<3x512xf32> to vector<1x512xf32>
    %8 = vector.extract_strided_slice %3 {offsets = [2, 0], sizes = [1, 512], strides = [1, 1]} : vector<3x512xf32> to vector<1x512xf32>
    %9 = tpu.iota {dimensions = array<i32: 0>} : vector<512x4xi32>
    %10 = tpu.iota {dimensions = array<i32: 1>} : vector<512x4xi32>
    %c128_i32 = arith.constant 128 : i32
    %11 = vector.broadcast %c128_i32 : i32 to vector<512x4xi32>
    %12 = arith.muli %10, %11 : vector<512x4xi32>
    %13 = arith.cmpi sge, %9, %12 : vector<512x4xi32>
    %c128_i32_5 = arith.constant 128 : i32
    %14 = vector.broadcast %c128_i32_5 : i32 to vector<512x4xi32>
    %15 = arith.addi %12, %14 : vector<512x4xi32>
    %16 = arith.cmpi slt, %9, %15 : vector<512x4xi32>
    %17 = arith.andi %13, %16 : vector<512x4xi1>
    %18 = arith.extui %17 : vector<512x4xi1> to vector<512x4xi32>
    %19 = arith.sitofp %18 : vector<512x4xi32> to vector<512x4xf32>
    %20 = tpu.iota {dimensions = array<i32: 1>} : vector<4x512xi32>
    %21 = tpu.iota {dimensions = array<i32: 0>} : vector<4x512xi32>
    %c128_i32_6 = arith.constant 128 : i32
    %22 = vector.broadcast %c128_i32_6 : i32 to vector<4x512xi32>
    %23 = arith.muli %21, %22 : vector<4x512xi32>
    %24 = arith.cmpi sge, %20, %23 : vector<4x512xi32>
    %c128_i32_7 = arith.constant 128 : i32
    %25 = vector.broadcast %c128_i32_7 : i32 to vector<4x512xi32>
    %26 = arith.addi %23, %25 : vector<4x512xi32>
    %27 = arith.cmpi slt, %20, %26 : vector<4x512xi32>
    %28 = arith.andi %24, %27 : vector<4x512xi1>
    %29 = arith.extui %28 : vector<4x512xi1> to vector<4x512xi32>
    %30 = arith.sitofp %29 : vector<4x512xi32> to vector<4x512xf32>
    %cst_8 = arith.constant dense<0.000000e+00> : vector<2x4xf32>
    %31 = tpu.matmul %6, %19, %cst_8 {dimension_numbers = #tpu.dot_dimension_numbers<[1], [0], [0], [1], [0, 0, 1, 1], [], []>} : vector<2x512xf32>, vector<512x4xf32>, vector<2x4xf32> -> vector<2x4xf32>
    %cst_9 = arith.constant 7.812500e-03 : f32
    %32 = vector.broadcast %cst_9 : f32 to vector<2x4xf32>
    %33 = arith.mulf %31, %32 : vector<2x4xf32>
    %cst_10 = arith.constant dense<0.000000e+00> : vector<2x512xf32>
    %34 = tpu.matmul %33, %30, %cst_10 {dimension_numbers = #tpu.dot_dimension_numbers<[1], [0], [0], [1], [0, 0, 1, 1], [], []>} : vector<2x4xf32>, vector<4x512xf32>, vector<2x512xf32> -> vector<2x512xf32>
    %35 = arith.subf %6, %34 : vector<2x512xf32>
    %36 = arith.mulf %35, %35 : vector<2x512xf32>
    %cst_11 = arith.constant dense<0.000000e+00> : vector<2x4xf32>
    %37 = tpu.matmul %36, %19, %cst_11 {dimension_numbers = #tpu.dot_dimension_numbers<[1], [0], [0], [1], [0, 0, 1, 1], [], []>} : vector<2x512xf32>, vector<512x4xf32>, vector<2x4xf32> -> vector<2x4xf32>
    %cst_12 = arith.constant 7.812500e-03 : f32
    %38 = vector.broadcast %cst_12 : f32 to vector<2x4xf32>
    %39 = arith.mulf %37, %38 : vector<2x4xf32>
    %cst_13 = arith.constant dense<0.000000e+00> : vector<2x512xf32>
    %40 = tpu.matmul %39, %30, %cst_13 {dimension_numbers = #tpu.dot_dimension_numbers<[1], [0], [0], [1], [0, 0, 1, 1], [], []>} : vector<2x4xf32>, vector<4x512xf32>, vector<2x512xf32> -> vector<2x512xf32>
    %cst_14 = arith.constant 9.99999974E-6 : f32
    %41 = vector.broadcast %cst_14 : f32 to vector<2x512xf32>
    %42 = arith.addf %40, %41 : vector<2x512xf32>
    %43 = math.rsqrt %42 : vector<2x512xf32>
    %44 = arith.mulf %35, %43 : vector<2x512xf32>
    %45 = vector.broadcast %7 : vector<1x512xf32> to vector<2x512xf32>
    %46 = arith.mulf %44, %45 : vector<2x512xf32>
    %47 = vector.broadcast %8 : vector<1x512xf32> to vector<2x512xf32>
    %48 = arith.addf %46, %47 : vector<2x512xf32>
    %c0_15 = arith.constant 0 : index
    %c0_16 = arith.constant 0 : index
    %49 = vector.load %arg3[%c0_15, %c0_16] : memref<2x512xf32, #tpu.memory_space<vmem>>, vector<2x512xf32>
    tpu.vector_store %arg3[%c0_15, %c0_16], %48 {strides = array<i32>} : memref<2x512xf32, #tpu.memory_space<vmem>>, vector<2x512xf32>,
    return
  }
}

</mosaic_0001>

<bundles_post_ra>
// kernel: image_proj_forward.1
= control target key start
LH: loop header
LB: loop body
LE: loop exit
PB: predicated region body
PF: predicated region fallthrough
CT: control target
= control target key end

     0   :  { %v83_v34 = vlaneseq  ;;  %v2318_v40 = vmov 1966171168   ;;  %s3654_s1 = inlined_call_operand.vmem [shape: bf16[256,512], index: 1, kind: input, shape index: {}]   ;;  %s3655_s0 = inlined_call_operand.vmem [shape: bf16[2,256], index: 0, kind: input, shape index: {}]   ;;  %s3656_s2 = inlined_call_operand.vmem [shape: f32[3,512], index: 2, kind: input, shape index: {}]   ;;  %s3657_s3 = inlined_call_operand.vmem [shape: f32[2,512], index: 3, kind: output, shape index: {}]  }
   0x1   :  { %v2214_v0 = vld [vmem:[%s3654_s1 + $0x4] ss:$16 sps:$4 sm:$0xff]   ;;  %v2216_v1 = vld [vmem:[%s3654_s1 + $0xc] ss:$16 sps:$4 sm:$0xff]   ;;  %v2218_v2 = vld [vmem:[%s3654_s1] ss:$16 sps:$4 sm:$0xff]   ;;  %v129_v41 = vunpack.c.l.s4 %v2318_v40 }
   0x2   :  { %464 = vmatprep.subr.bf16.mxu0 %v2214_v0  ;;  %v2219_v3 = vld [vmem:[%s3654_s1 + $0x8] ss:$16 sps:$4 sm:$0xff]   ;;  %505 = vmatprep.subr.bf16.mxu1 %v2216_v1  ;;  %v2220_v4 = vld [vmem:[%s3654_s1 + $0x24] ss:$16 sps:$4 sm:$0xff]   ;;  %v2222_v5 = vld [vmem:[%s3654_s1 + $0x2c] ss:$16 sps:$4 sm:$0xff]  }
   0x3   :  { %465 = vmatpush1.bf16.msra.mxu0 %v2218_v2  ;;  %506 = vmatpush1.bf16.msra.mxu1 %v2219_v3  ;;  %v2224_v6 = vld [vmem:[%s3654_s1 + $0x20] ss:$16 sps:$4 sm:$0xff]   ;;  %v2225_v7 = vld [vmem:[%s3654_s1 + $0x28] ss:$16 sps:$4 sm:$0xff]   ;;  %v2226_v8 = vld [vmem:[%s3654_s1 + $0x44] ss:$16 sps:$4 sm:$0xff]   ;;  %v130_v48 = vunpack.c.0.s8 %v129_v41 }
   0x4   :  { %466 = vmatprep.subr.bf16.mxu0 %v2220_v4  ;;  %507 = vmatprep.subr.bf16.mxu1 %v2222_v5  ;;  %v2228_v9 = vld [vmem:[%s3654_s1 + $0x4c] ss:$16 sps:$4 sm:$0xff]   ;;  %v2230_v10 = vld [vmem:[%s3654_s1 + $0x40] ss:$16 sps:$4 sm:$0xff]   ;;  %v2231_v11 = vld [vmem:[%s3654_s1 + $0x48] ss:$16 sps:$4 sm:$0xff]  }
   0x5   :  { %v2232_v12 = vld [vmem:[%s3654_s1 + $0x64] ss:$16 sps:$4 sm:$0xff]   ;;  %v2234_v13 = vld [vmem:[%s3654_s1 + $0x6c] ss:$16 sps:$4 sm:$0xff]   ;;  %v2236_v14 = vld [vmem:[%s3654_s1 + $0x60] ss:$16 sps:$4 sm:$0xff]  }
   0x6   :  { %v2237_v15 = vld [vmem:[%s3654_s1 + $0x68] ss:$16 sps:$4 sm:$0xff]   ;;  %v2238_v16 = vld [vmem:[%s3654_s1 + $0x84] ss:$16 sps:$4 sm:$0xff]   ;;  %v2240_v17 = vld [vmem:[%s3654_s1 + $0x8c] ss:$16 sps:$4 sm:$0xff]  }
   0x7   :  { %467 = vmatpush1.bf16.msra.mxu0 %v2224_v6  ;;  %508 = vmatpush1.bf16.msra.mxu1 %v2225_v7  ;;  %v2242_v18 = vld [vmem:[%s3654_s1 + $0x80] ss:$16 sps:$4 sm:$0xff]   ;;  %v2243_v19 = vld [vmem:[%s3654_s1 + $0x88] ss:$16 sps:$4 sm:$0xff]   ;;  %v2244_v20 = vld [vmem:[%s3654_s1 + $0xa4] ss:$16 sps:$4 sm:$0xff]  }
   0x8   :  { %468 = vmatprep.subr.bf16.mxu0 %v2226_v8  ;;  %509 = vmatprep.subr.bf16.mxu1 %v2228_v9  ;;  %v2246_v21 = vld [vmem:[%s3654_s1 + $0xac] ss:$16 sps:$4 sm:$0xff]   ;;  %v2248_v22 = vld [vmem:[%s3654_s1 + $0xa0] ss:$16 sps:$4 sm:$0xff]   ;;  %v2249_v23 = vld [vmem:[%s3654_s1 + $0xa8] ss:$16 sps:$4 sm:$0xff]  }
   0x9   :  { %v2250_v24 = vld [vmem:[%s3654_s1 + $0xc4] ss:$16 sps:$4 sm:$0xff]   ;;  %v2252_v25 = vld [vmem:[%s3654_s1 + $0xcc] ss:$16 sps:$4 sm:$0xff]   ;;  %v2254_v26 = vld [vmem:[%s3654_s1 + $0xc0] ss:$16 sps:$4 sm:$0xff]  }
   0xa   :  { %v2255_v27 = vld [vmem:[%s3654_s1 + $0xc8] ss:$16 sps:$4 sm:$0xff]   ;;  %v2256_v28 = vld [vmem:[%s3654_s1 + $0xe4] ss:$16 sps:$4 sm:$0xff]   ;;  %v2258_v29 = vld [vmem:[%s3654_s1 + $0xec] ss:$16 sps:$4 sm:$0xff]  }
   0xb   :  { %469 = vmatpush1.bf16.msra.mxu0 %v2230_v10  ;;  %510 = vmatpush1.bf16.msra.mxu1 %v2231_v11  ;;  %v2260_v30 = vld [vmem:[%s3654_s1 + $0xe0] ss:$16 sps:$4 sm:$0xff]   ;;  %v2261_v31 = vld [vmem:[%s3654_s1 + $0xe8] ss:$16 sps:$4 sm:$0xff]   ;;  %v2262_v32 = vld [vmem:[%s3654_s1 + $0x104] ss:$16 sps:$4 sm:$0xff]  }
   0xc   :  { %470 = vmatprep.subr.bf16.mxu0 %v2232_v12  ;;  %511 = vmatprep.subr.bf16.mxu1 %v2234_v13  ;;  %v2264_v33 = vld [vmem:[%s3654_s1 + $0x10c] ss:$16 sps:$4 sm:$0xff]   ;;  %v2266_v35 = vld [vmem:[%s3654_s1 + $0x100] ss:$16 sps:$4 sm:$0xff]   ;;  %v2267_v36 = vld [vmem:[%s3654_s1 + $0x108] ss:$16 sps:$4 sm:$0xff]  }
   0xd   :  { %v2450_v37 = vand.u32 127, %v83_v34  ;;  %v2268_v38 = vld [vmem:[%s3654_s1 + $0x124] ss:$16 sps:$4 sm:$0xff]   ;;  %v2270_v39 = vld [vmem:[%s3654_s1 + $0x12c] ss:$16 sps:$4 sm:$0xff]   ;;  %v2473_v47 = vshrl.u32 %v83_v34, 7 }
   0xe   :  { %v2272_v42 = vld [vmem:[%s3654_s1 + $0x120] ss:$16 sps:$4 sm:$0xff]   ;;  %v2273_v44 = vld [vmem:[%s3654_s1 + $0x128] ss:$16 sps:$4 sm:$0xff]   ;;  %v2274_v45 = vld [vmem:[%s3654_s1 + $0x144] ss:$16 sps:$4 sm:$0xff]  }
   0xf   :  { %471 = vmatpush1.bf16.msra.mxu0 %v2236_v14  ;;  %512 = vmatpush1.bf16.msra.mxu1 %v2237_v15  ;;  %v2462_v43 = vmul.u32 128, %v2450_v37  ;;  %v2276_v46 = vld [vmem:[%s3654_s1 + $0x14c] ss:$16 sps:$4 sm:$0xff]   ;;  %v2278_v49 = vld [vmem:[%s3654_s1 + $0x140] ss:$16 sps:$4 sm:$0xff]   ;;  %v563_v51 = vadd.s32 128, %v2473_v47  ;;  %v2494_v57 = vsub.s32 %v130_v48, %v2473_v47 }
  0x10   :  { %472 = vmatprep.subr.bf16.mxu0 %v2238_v16  ;;  %513 = vmatprep.subr.bf16.mxu1 %v2240_v17  ;;  %v2279_v50 = vld [vmem:[%s3654_s1 + $0x148] ss:$16 sps:$4 sm:$0xff]   ;;  %v2280_v53 = vld [vmem:[%s3654_s1 + $0x164] ss:$16 sps:$4 sm:$0xff]   ;;  %v564_v54 = vadd.s32 136, %v2473_v47  ;;  %v595_v56 = vadd.s32 384, %v2473_v47 }
  0x11   :  { %v2483_v52 = vadd.s32 128, %v2462_v43  ;;  %v2282_v55 = vld [vmem:[%s3654_s1 + $0x16c] ss:$16 sps:$4 sm:$0xff]   ;;  %v596_v58 = vadd.s32 392, %v2473_v47  ;;  %vm630_vm0 = vcmp.ge.s32.totalorder %v563_v51, %v2462_v43  ;;  %v2284_v60 = vld [vmem:[%s3654_s1 + $0x160] ss:$16 sps:$4 sm:$0xff]   ;;  %vm614_vm10 = vcmp.ge.s32.totalorder %v2473_v47, %v2462_v43 }
  0x12   :  { %v2500_v59 = vld.sshfl [vmem:[%s3655_s0] sm:$0x11 pattern:$0x75316420]  ;;  %v2285_v61 = vld [vmem:[%s3654_s1 + $0x168] ss:$16 sps:$4 sm:$0xff]   ;;  %vm631_vm2 = vcmp.ge.s32.totalorder %v564_v54, %v2462_v43  ;;  %vm662_vm4 = vcmp.ge.s32.totalorder %v595_v56, %v2462_v43 }
  0x13   :  { %473 = vmatpush1.bf16.msra.mxu0 %v2242_v18  ;;  %514 = vmatpush1.bf16.msra.mxu1 %v2243_v19  ;;  %vm695_vm1 = vcmp.lt.s32.totalorder %v563_v51, %v2483_v52  ;;  %v127_v62 = vcombine.high %v2500_v59, %v2500_v59  ;;  %vm696_vm3 = vcmp.lt.s32.totalorder %v564_v54, %v2483_v52  ;;  %v548_v63 = vadd.s32 8, %v2473_v47  ;;  %v2286_v0 = vld [vmem:[%s3654_s1 + $0x184] ss:$16 sps:$4 sm:$0xff]   ;;  %v2288_v1 = vld [vmem:[%s3654_s1 + $0x18c] ss:$16 sps:$4 sm:$0xff]  }
  0x14   :  { %474 = vmatprep.subr.bf16.mxu0 %v2244_v20  ;;  %515 = vmatprep.subr.bf16.mxu1 %v2246_v21  ;;  %vm727_vm5 = vcmp.lt.s32.totalorder %v595_v56, %v2483_v52  ;;  %v579_v2 = vadd.s32 256, %v2473_v47  ;;  %vm2529_vm6 = vmand %vm630_vm0, %vm695_vm1  ;;  %v3780_v4 = vmov 0  ;;  %vm663_vm7 = vcmp.ge.s32.totalorder %v596_v58, %v2462_v43  ;;  %v2290_v8 = vld [vmem:[%s3654_s1 + $0x180] ss:$16 sps:$4 sm:$0xff]   ;;  %v2291_v9 = vld [vmem:[%s3654_s1 + $0x188] ss:$16 sps:$4 sm:$0xff]  }
  0x15   :  { %v141_v3 = vrot.slane %v127_v62, %v2494_v57  ;;  %v3781_v4 = vsel %vm2529_vm6, 4294967295, %v3780_v4  ;;  %vm728_vm8 = vcmp.lt.s32.totalorder %v596_v58, %v2483_v52  ;;  %v580_v5 = vadd.s32 264, %v2473_v47  ;;  %vm2538_vm9 = vmand %vm631_vm2, %vm696_vm3  ;;  %v2292_v12 = vld [vmem:[%s3654_s1 + $0x1a4] ss:$16 sps:$4 sm:$0xff]   ;;  %v2294_v13 = vld [vmem:[%s3654_s1 + $0x1ac] ss:$16 sps:$4 sm:$0xff]  }
  0x16   :  { %v3782_v6 = vmov 0  ;;  %vm679_vm11 = vcmp.lt.s32.totalorder %v2473_v47, %v2483_v52  ;;  %v565_v7 = vadd.s32 144, %v2473_v47  ;;  %vm2557_vm12 = vmand %vm662_vm4, %vm727_vm5  ;;  %v3784_v10 = vmov 0  ;;  %v2296_v19 = vld [vmem:[%s3654_s1 + $0x1a0] ss:$16 sps:$4 sm:$0xff]  }
  0x17   :  { %475 = vmatpush1.bf16.msra.mxu0 %v2248_v22  ;;  %516 = vmatpush1.bf16.msra.mxu1 %v2249_v23  ;;  %v3783_v6 = vsel %vm2538_vm9, 4294967295, %v3782_v6  ;;  %v3785_v10 = vsel %vm2557_vm12, 4294967295, %v3784_v10  ;;  %vm615_vm13 = vcmp.ge.s32.totalorder %v548_v63, %v2462_v43  ;;  %vm680_vm14 = vcmp.lt.s32.totalorder %v548_v63, %v2483_v52  ;;  %vm2574_vm15 = vmand %vm663_vm7, %vm728_vm8  ;;  %v2297_v20 = vld [vmem:[%s3654_s1 + $0x1a8] ss:$16 sps:$4 sm:$0xff]   ;;  %v2298_v22 = vld [vmem:[%s3654_s1 + $0x1c4] ss:$16 sps:$4 sm:$0xff]  }
  0x18   :  { %476 = vmatprep.subr.bf16.mxu0 %v2250_v24  ;;  %517 = vmatprep.subr.bf16.mxu1 %v2252_v25  ;;  %v566_v11 = vadd.s32 152, %v2473_v47  ;;  %v3786_v14 = vmov 0  ;;  %vm646_vm0 = vcmp.ge.s32.totalorder %v579_v2, %v2462_v43  ;;  %vm711_vm1 = vcmp.lt.s32.totalorder %v579_v2, %v2483_v52  ;;  %vm2586_vm2 = vmand %vm614_vm10, %vm679_vm11  ;;  %v2300_v23 = vld [vmem:[%s3654_s1 + $0x1cc] ss:$16 sps:$4 sm:$0xff]   ;;  %v2309_v40 = vld [vmem:[%s3654_s1 + $0x1e8] ss:$16 sps:$4 sm:$0xff]  }
  0x19   :  { %v3787_v14 = vsel %vm2574_vm15, 4294967295, %v3786_v14  ;;  %496 = vmatprep.mubr.bf16.mxu0 %v141_v3  ;;  %537 = vmatprep.mubr.bf16.mxu1 %v141_v3  ;;  %v3788_v15 = vmov 0  ;;  %vm647_vm3 = vcmp.ge.s32.totalorder %v580_v5, %v2462_v43  ;;  %vm712_vm4 = vcmp.lt.s32.totalorder %v580_v5, %v2483_v52  ;;  %vm2597_vm5 = vmand %vm615_vm13, %vm680_vm14 }
  0x1a   :  { %v3789_v15 = vsel %vm2586_vm2, 4294967295, %v3788_v15  ;;  %v597_v16 = vadd.s32 400, %v2473_v47  ;;  %v3790_v17 = vmov 0  ;;  %vm632_vm7 = vcmp.ge.s32.totalorder %v565_v7, %v2462_v43  ;;  %vm2614_vm10 = vmand %vm646_vm0, %vm711_vm1 }
  0x1b   :  { %477 = vmatpush1.bf16.msra.mxu0 %v2254_v26  ;;  %518 = vmatpush1.bf16.msra.mxu1 %v2255_v27  ;;  %v3791_v17 = vsel %vm2597_vm5, 4294967295, %v3790_v17  ;;  %vm697_vm8 = vcmp.lt.s32.totalorder %v565_v7, %v2483_v52  ;;  %v598_v18 = vadd.s32 408, %v2473_v47  ;;  %v3792_v21 = vmov 0  ;;  %vm2630_vm14 = vmand %vm647_vm3, %vm712_vm4 }
  0x1c   :  { %478 = vmatprep.subr.bf16.mxu0 %v2256_v28  ;;  %519 = vmatprep.subr.bf16.mxu1 %v2258_v29  ;;  %v3793_v21 = vsel %vm2614_vm10, 4294967295, %v3792_v21  ;;  %vm633_vm11 = vcmp.ge.s32.totalorder %v566_v11, %v2462_v43  ;;  %vm698_vm13 = vcmp.lt.s32.totalorder %v566_v11, %v2483_v52  ;;  %v3794_v24 = vmov 0  ;;  %vm2643_vm1 = vmand %vm632_vm7, %vm697_vm8  ;;  %v2302_v29 = vld [vmem:[%s3654_s1 + $0x1c0] ss:$16 sps:$4 sm:$0xff]  }
  0x1d   :  { %v3795_v24 = vsel %vm2630_vm14, 4294967295, %v3794_v24  ;;  %v549_v25 = vadd.s32 16, %v2473_v47  ;;  %v3796_v26 = vmov 0  ;;  %vm664_vm3 = vcmp.ge.s32.totalorder %v597_v16, %v2462_v43  ;;  %vm2650_vm14 = vmand %vm633_vm11, %vm698_vm13 }
  0x1e   :  { %v3797_v26 = vsel %vm2643_vm1, 4294967295, %v3796_v26  ;;  %vm729_vm4 = vcmp.lt.s32.totalorder %v597_v16, %v2483_v52  ;;  %v550_v27 = vadd.s32 24, %v2473_v47  ;;  %v3801_v34 = vmov 0 }
  0x1f   :  { %479 = vmatpush1.bf16.msra.mxu0 %v2260_v30  ;;  %520 = vmatpush1.bf16.msra.mxu1 %v2261_v31  ;;  %v2303_v30 = vld [vmem:[%s3654_s1 + $0x1c8] ss:$16 sps:$4 sm:$0xff]   ;;  %v581_v31 = vadd.s32 272, %v2473_v47  ;;  %vm2685_vm7 = vmand %vm664_vm3, %vm729_vm4  ;;  %vm616_vm0 = vcmp.ge.s32.totalorder %v549_v25, %v2462_v43  ;;  %vm681_vm6 = vcmp.lt.s32.totalorder %v549_v25, %v2483_v52  ;;  %vm3803_vm13 = vcmp.lt.s32.totalorder %v598_v18, %v2483_v52 }
  0x20   :  { %480 = vmatprep.subr.bf16.mxu0 %v2262_v32  ;;  %521 = vmatprep.subr.bf16.mxu1 %v2264_v33  ;;  %v2304_v32 = vld [vmem:[%s3654_s1 + $0x1e4] ss:$16 sps:$4 sm:$0xff]   ;;  %v2306_v33 = vld [vmem:[%s3654_s1 + $0x1ec] ss:$16 sps:$4 sm:$0xff]   ;;  %v3802_v34 = vsel %vm2685_vm7, 4294967295, %v3801_v34  ;;  %vm3804_vm10 = vcmp.ge.s32.totalorder %v598_v18, %v2462_v43  ;;  %vm617_vm3 = vcmp.ge.s32.totalorder %v550_v27, %v2462_v43  ;;  %vm682_vm4 = vcmp.lt.s32.totalorder %v550_v27, %v2483_v52 }
  0x21   :  { %vm2700_vm11 = vmand %vm3804_vm10, %vm3803_vm13  ;;  %v3807_v41 = vmov 0  ;;  %vm648_vm13 = vcmp.ge.s32.totalorder %v581_v31, %v2462_v43  ;;  %vm713_vm2 = vcmp.lt.s32.totalorder %v581_v31, %v2483_v52  ;;  %v3811_v48 = vmov 0 }
  0x22   :  { %vm2717_vm10 = vmand %vm616_vm0, %vm681_vm6  ;;  %v3734_v51 = vmov 1.0|1.0   ;;  %v3818_v54 = vmov 0  ;;  %v3820_v56 = vmov 0  ;;  %v3832_v58 = vmov 0 }
  0x23   :  { %481 = vmatpush1.bf16.msra.mxu0 %v2266_v35  ;;  %522 = vmatpush1.bf16.msra.mxu1 %v2267_v36  ;;  %v582_v35 = vadd.s32 280, %v2473_v47  ;;  %v3805_v36 = vmov 0  ;;  %v3808_v41 = vsel %vm2717_vm10, 4294967295, %v3807_v41  ;;  %vm2724_vm8 = vmand %vm617_vm3, %vm682_vm4  ;;  %v3840_v62 = vmov 0 }
  0x24   :  { %482 = vmatprep.subr.bf16.mxu0 %v2268_v38  ;;  %523 = vmatprep.subr.bf16.mxu1 %v2270_v39  ;;  %v3806_v36 = vsel %vm2700_vm11, 4294967295, %v3805_v36  ;;  %v567_v38 = vadd.s32 160, %v2473_v47  ;;  %v2308_v39 = vld [vmem:[%s3654_s1 + $0x1e0] ss:$16 sps:$4 sm:$0xff]   ;;  %vm2737_vm0 = vmand %vm648_vm13, %vm713_vm2  ;;  %vm3815_vm2 = vnez %v3781_v4  ;;  %v570_v63 = vadd.s32 184, %v2473_v47 }
  0x25   :  { %vm649_vm7 = vcmp.ge.s32.totalorder %v582_v35, %v2462_v43  ;;  %vm714_vm11 = vcmp.lt.s32.totalorder %v582_v35, %v2483_v52  ;;  %v3812_v48 = vsel %vm2737_vm0, 4294967295, %v3811_v48  ;;  %vm3816_vm13 = vmpackc.low %vm2538_vm9, %vm3815_vm2  ;;  %vm3825_vm9 = vnez %v3793_v21 }
  0x26   :  { %vm634_vm3 = vcmp.ge.s32.totalorder %v567_v38, %v2462_v43  ;;  %vm699_vm4 = vcmp.lt.s32.totalorder %v567_v38, %v2483_v52  ;;  %vm2744_vm1 = vmand %vm649_vm7, %vm714_vm11  ;;  %v3848_v2 = vmov 0  ;;  %v602_v3 = vadd.s32 440, %v2473_v47 }
  0x27   :  { %483 = vmatpush1.bf16.msra.mxu0 %v2272_v42  ;;  %524 = vmatpush1.bf16.msra.mxu1 %v2273_v44  ;;  %v568_v42 = vadd.s32 168, %v2473_v47  ;;  %v3809_v44 = vmov 0  ;;  %vm3817_vm7 = vmpackc.low %vm2574_vm15, %vm2557_vm12  ;;  %vm3824_vm15 = vnez %v3795_v24  ;;  %v3850_v5 = vmov 0 }
  0x28   :  { %484 = vmatprep.subr.bf16.mxu0 %v2274_v45  ;;  %525 = vmatprep.subr.bf16.mxu1 %v2276_v46  ;;  %v3810_v44 = vsel %vm2724_vm8, 4294967295, %v3809_v44  ;;  %v599_v45 = vadd.s32 416, %v2473_v47  ;;  %v134_v46 = vrot.slane %v2500_v59, %v2494_v57  ;;  %vm2767_vm8 = vmand %vm634_vm3, %vm699_vm4  ;;  %vm3822_vm3 = vnez %v3789_v15 }
  0x29   :  { %vm635_vm6 = vcmp.ge.s32.totalorder %v568_v42, %v2462_v43  ;;  %vm700_vm10 = vcmp.lt.s32.totalorder %v568_v42, %v2483_v52  ;;  %v3819_v54 = vsel %vm2767_vm8, 4294967295, %v3818_v54  ;;  %vm3823_vm4 = vmpackc.low %vm2597_vm5, %vm3822_vm3  ;;  %v583_v57 = vadd.s32 288, %v2473_v47 }
  0x2a   :  { %vm731_vm2 = vcmp.lt.s32.totalorder %v599_v45, %v2483_v52  ;;  %vm3827_vm3 = vnez %v3797_v26  ;;  %vm3829_vm5 = vnez %v3806_v36  ;;  %v584_v59 = vadd.s32 296, %v2473_v47 }
  0x2b   :  { %485 = vmatpush1.bf16.msra.mxu0 %v2278_v49  ;;  %526 = vmatpush1.bf16.msra.mxu1 %v2279_v50  ;;  %v600_v49 = vadd.s32 424, %v2473_v47  ;;  %v553_v7 = vadd.s32 48, %v2473_v47  ;;  %v3854_v11 = vmov 0  ;;  %v586_v16 = vadd.s32 312, %v2473_v47 }
  0x2c   :  { %486 = vmatprep.subr.bf16.mxu0 %v2280_v53  ;;  %527 = vmatprep.subr.bf16.mxu1 %v2282_v55  ;;  %v551_v53 = vadd.s32 32, %v2473_v47  ;;  %v552_v55 = vadd.s32 40, %v2473_v47  ;;  %v3858_v18 = vmov 0  ;;  %v603_v25 = vadd.s32 448, %v2473_v47 }
  0x2d   :  { %vm667_vm11 = vcmp.ge.s32.totalorder %v600_v49, %v2462_v43  ;;  %vm732_vm12 = vcmp.lt.s32.totalorder %v600_v49, %v2483_v52  ;;  %v3864_v27 = vmov 0  ;;  %v555_v31 = vadd.s32 64, %v2473_v47 }
  0x2e   :  { %vm683_vm8 = vcmp.lt.s32.totalorder %v551_v53, %v2483_v52  ;;  %v3870_v35 = vmov 0  ;;  %v587_v38 = vadd.s32 320, %v2473_v47  ;;  %v3874_v42 = vmov 0 }
  0x2f   :  { %487 = vmatpush1.bf16.msra.mxu0 %v2284_v60  ;;  %528 = vmatpush1.bf16.msra.mxu1 %v2285_v61  ;;  %v3834_v60 = vmov 0  ;;  %v569_v61 = vadd.s32 176, %v2473_v47  ;;  %v574_v49 = vadd.s32 216, %v2473_v47 }
  0x30   :  { %488 = vmatprep.subr.bf16.mxu0 %v2286_v0  ;;  %529 = vmatprep.subr.bf16.mxu1 %v2288_v1  ;;  %v3846_v0 = vmov 0  ;;  %v601_v1 = vadd.s32 432, %v2473_v47 }
  0x33   :  { %489 = vmatpush1.bf16.msra.mxu0 %v2290_v8  ;;  %530 = vmatpush1.bf16.msra.mxu1 %v2291_v9  ;;  %v3852_v8 = vmov 0  ;;  %v554_v9 = vadd.s32 56, %v2473_v47 }
  0x34   :  { %490 = vmatprep.subr.bf16.mxu0 %v2292_v12  ;;  %531 = vmatprep.subr.bf16.mxu1 %v2294_v13  ;;  %v585_v12 = vadd.s32 304, %v2473_v47  ;;  %v3856_v13 = vmov 0 }
  0x37   :  { %491 = vmatpush1.bf16.msra.mxu0 %v2296_v19  ;;  %532 = vmatpush1.bf16.msra.mxu1 %v2297_v20  ;;  %v571_v19 = vadd.s32 192, %v2473_v47  ;;  %v3860_v20 = vmov 0 }
  0x38   :  { %492 = vmatprep.subr.bf16.mxu0 %v2298_v22  ;;  %533 = vmatprep.subr.bf16.mxu1 %v2300_v23  ;;  %v572_v22 = vadd.s32 200, %v2473_v47  ;;  %v3862_v23 = vmov 0 }
  0x3b   :  { %493 = vmatpush1.bf16.msra.mxu0 %v2302_v29  ;;  %534 = vmatpush1.bf16.msra.mxu1 %v2303_v30  ;;  %v604_v29 = vadd.s32 456, %v2473_v47  ;;  %v3866_v30 = vmov 0 }
  0x3c   :  { %494 = vmatprep.subr.bf16.mxu0 %v2304_v32  ;;  %535 = vmatprep.subr.bf16.mxu1 %v2306_v33  ;;  %v3868_v32 = vmov 0  ;;  %v556_v33 = vadd.s32 72, %v2473_v47 }
  0x3f   :  { %495 = vmatpush1.bf16.msra.mxu0 %v2308_v39  ;;  %536 = vmatpush1.bf16.msra.mxu1 %v2309_v40  ;;  %v3872_v39 = vmov 0  ;;  %v588_v40 = vadd.s32 328, %v2473_v47 }
  0x40   :  { %2083 = vmatprep.subr.msk.bf16.mxu0 %vm3816_vm13, %v3734_v51  ;;  %2115 = vmatprep.subr.msk.bf16.mxu1 %vm3817_vm7, %v3734_v51  ;;  %vm666_vm13 = vcmp.ge.s32.totalorder %v599_v45, %v2462_v43  ;;  %vm2774_vm7 = vmand %vm635_vm6, %vm700_vm10  ;;  %vm618_vm6 = vcmp.ge.s32.totalorder %v551_v53, %v2462_v43  ;;  %v573_v45 = vadd.s32 208, %v2473_v47  ;;  %v3878_v53 = vmov 0 }
  0x41   :  { %v3821_v56 = vsel %vm2774_vm7, 4294967295, %v3820_v56  ;;  %vm3826_vm10 = vmpackc.low %vm3824_vm15, %vm3825_vm9  ;;  %vm3830_vm9 = vnez %v3802_v34 }
  0x42   :  { %497 = vmatmul.mubr.bf16.vlgmr.msra.gmra.mrb[0].mxu0 %v134_v46  ;;  %538 = vmatmul.mubr.bf16.vlgmr.msra.gmra.mrb[0].mxu1 %v134_v46  ;;  %vm2809_vm15 = vmand %vm666_vm13, %vm731_vm2  ;;  %vm3836_vm13 = vnez %v3810_v44  ;;  %vm650_vm2 = vcmp.ge.s32.totalorder %v583_v57, %v2462_v43  ;;  %v3876_v46 = vmov 0 }
  0x43   :  { %2085 = vmatpush3.bf16.msk.msra.mxu0 %vm3823_vm4, %v3734_v51  ;;  %2117 = vmatpush3.bf16.msk.msra.mxu1 %vm3826_vm10, %v3734_v51  ;;  %vm3828_vm4 = vmpackc.low %vm2650_vm14, %vm3827_vm3  ;;  %v3833_v58 = vsel %vm2809_vm15, 4294967295, %v3832_v58  ;;  %vm684_vm3 = vcmp.lt.s32.totalorder %v552_v55, %v2483_v52 }
  0x44   :  { %2087 = vmatprep.subr.msk.bf16.mxu0 %vm3828_vm4, %v3734_v51  ;;  %vm3831_vm10 = vmpackc.low %vm3829_vm5, %vm3830_vm9  ;;  %vm619_vm4 = vcmp.ge.s32.totalorder %v552_v55, %v2462_v43  ;;  %vm715_vm5 = vcmp.lt.s32.totalorder %v583_v57, %v2483_v52  ;;  %v605_v55 = vadd.s32 464, %v2473_v47  ;;  %v3880_v57 = vmov 0 }
  0x45   :  { %2119 = vmatprep.subr.msk.bf16.mxu1 %vm3831_vm10, %v3734_v51  ;;  %vm2816_vm7 = vmand %vm667_vm11, %vm732_vm12  ;;  %vm3837_vm10 = vnez %v3808_v41 }
  0x46   :  { %v3835_v60 = vsel %vm2816_vm7, 4294967295, %v3834_v60  ;;  %vm3838_vm12 = vmpackc.low %vm3836_vm13, %vm3837_vm10  ;;  %vm3843_vm10 = vnez %v3819_v54 }
  0x47   :  { %2089 = vmatpush3.bf16.msk.msra.mxu0 %vm3838_vm12, %v3734_v51  ;;  %vm3839_vm11 = vmpackc.low %vm2744_vm1, %vm2737_vm0  ;;  %vm3842_vm12 = vnez %v3821_v56  ;;  %vm716_vm0 = vcmp.lt.s32.totalorder %v584_v59, %v2483_v52 }
  0x48   :  { %2121 = vmatpush3.bf16.msk.msra.mxu1 %vm3839_vm11, %v3734_v51  ;;  %vm2839_vm9 = vmand %vm618_vm6, %vm683_vm8  ;;  %vm651_vm11 = vcmp.ge.s32.totalorder %v584_v59, %v2462_v43  ;;  %v606_v59 = vadd.s32 472, %v2473_v47 }
  0x49   :  { %v3841_v62 = vsel %vm2839_vm9, 4294967295, %v3840_v62  ;;  %vm3844_vm13 = vmpackc.low %vm3842_vm12, %vm3843_vm10 }
  0x4a   :  { %2091 = vmatprep.subr.msk.bf16.mxu0 %vm3844_vm13, %v3734_v51  ;;  %vm3845_vm8 = vmpackc.low %vm2816_vm7, %vm2809_vm15  ;;  %vm734_vm7 = vcmp.lt.s32.totalorder %v602_v3, %v2483_v52 }
  0x4b   :  { %2123 = vmatprep.subr.msk.bf16.mxu1 %vm3845_vm8, %v3734_v51  ;;  %vm2858_vm6 = vmand %vm619_vm4, %vm684_vm3  ;;  %vm636_vm3 = vcmp.ge.s32.totalorder %v569_v61, %v2462_v43  ;;  %vm701_vm4 = vcmp.lt.s32.totalorder %v569_v61, %v2483_v52  ;;  %v3882_v61 = vmov 0 }
  0x4c   :  { %v3847_v0 = vsel %vm2858_vm6, 4294967295, %v3846_v0  ;;  %vm3685_vm13 = vmpackc.low %vm2858_vm6, %vm2839_vm9  ;;  %vm669_vm6 = vcmp.ge.s32.totalorder %v602_v3, %v2462_v43  ;;  %v558_v3 = vadd.s32 88, %v2473_v47 }
  0x4d   :  { %vm2869_vm10 = vmand %vm650_vm2, %vm715_vm5  ;;  %2093 = vmatpush3.bf16.msk.msra.mxu0 %vm3685_vm13, %v3734_v51  ;;  %vm637_vm5 = vcmp.ge.s32.totalorder %v570_v63, %v2462_v43  ;;  %vm702_vm2 = vcmp.lt.s32.totalorder %v570_v63, %v2483_v52  ;;  %vm733_vm13 = vcmp.lt.s32.totalorder %v601_v1, %v2483_v52  ;;  %v557_v63 = vadd.s32 80, %v2473_v47 }
  0x4e   :  { %v3849_v2 = vsel %vm2869_vm10, 4294967295, %v3848_v2  ;;  %vm2882_vm8 = vmand %vm651_vm11, %vm716_vm0  ;;  %vm668_vm11 = vcmp.ge.s32.totalorder %v601_v1, %v2462_v43  ;;  %v3884_v1 = vmov 0 }
  0x4f   :  { %v3851_v5 = vsel %vm2882_vm8, 4294967295, %v3850_v5  ;;  %vm3689_vm15 = vmpackc.low %vm2882_vm8, %vm2869_vm10  ;;  %vm621_vm10 = vcmp.ge.s32.totalorder %v554_v9, %v2462_v43  ;;  %vm686_vm8 = vcmp.lt.s32.totalorder %v554_v9, %v2483_v52  ;;  %v589_v9 = vadd.s32 336, %v2473_v47 }
  0x50   :  { %2125 = vmatpush3.bf16.msk.msra.mxu1 %vm3689_vm15, %v3734_v51  ;;  %vm2899_vm0 = vmand %vm636_vm3, %vm701_vm4 }
  0x51   :  { %v3853_v8 = vsel %vm2899_vm0, 4294967295, %v3852_v8  ;;  %vm2906_vm9 = vmand %vm637_vm5, %vm702_vm2  ;;  %vm620_vm5 = vcmp.ge.s32.totalorder %v553_v7, %v2462_v43  ;;  %vm685_vm2 = vcmp.lt.s32.totalorder %v553_v7, %v2483_v52  ;;  %v3887_v7 = vmov 0 }
  0x52   :  { %v3855_v11 = vsel %vm2906_vm9, 4294967295, %v3854_v11  ;;  %vm3692_vm3 = vmpackc.low %vm2906_vm9, %vm2899_vm0  ;;  %vm653_vm0 = vcmp.ge.s32.totalorder %v586_v16, %v2462_v43  ;;  %vm718_vm9 = vcmp.lt.s32.totalorder %v586_v16, %v2483_v52  ;;  %v590_v16 = vadd.s32 344, %v2473_v47 }
  0x53   :  { %2095 = vmatprep.subr.msk.bf16.mxu0 %vm3692_vm3, %v3734_v51  ;;  %vm2923_vm4 = vmand %vm668_vm11, %vm733_vm13  ;;  %vm717_vm11 = vcmp.lt.s32.totalorder %v585_v12, %v2483_v52 }
  0x54   :  { %v3857_v13 = vsel %vm2923_vm4, 4294967295, %v3856_v13  ;;  %vm2930_vm15 = vmand %vm669_vm6, %vm734_vm7  ;;  %vm652_vm6 = vcmp.ge.s32.totalorder %v585_v12, %v2462_v43  ;;  %v3890_v12 = vmov 0 }
  0x55   :  { %v3859_v18 = vsel %vm2930_vm15, 4294967295, %v3858_v18  ;;  %vm3695_vm13 = vmpackc.low %vm2930_vm15, %vm2923_vm4  ;;  %vm639_vm4 = vcmp.ge.s32.totalorder %v572_v22, %v2462_v43  ;;  %vm704_vm15 = vcmp.lt.s32.totalorder %v572_v22, %v2483_v52  ;;  %v575_v22 = vadd.s32 224, %v2473_v47 }
  0x56   :  { %2127 = vmatprep.subr.msk.bf16.mxu1 %vm3695_vm13, %v3734_v51  ;;  %vm2947_vm7 = vmand %vm620_vm5, %vm685_vm2  ;;  %vm703_vm2 = vcmp.lt.s32.totalorder %v571_v19, %v2483_v52 }
  0x57   :  { %v3861_v20 = vsel %vm2947_vm7, 4294967295, %v3860_v20  ;;  %vm2954_vm3 = vmand %vm621_vm10, %vm686_vm8  ;;  %vm638_vm8 = vcmp.ge.s32.totalorder %v571_v19, %v2462_v43  ;;  %v3893_v19 = vmov 0 }
  0x58   :  { %v3863_v23 = vsel %vm2954_vm3, 4294967295, %v3862_v23  ;;  %vm3698_vm5 = vmpackc.low %vm2954_vm3, %vm2947_vm7  ;;  %vm671_vm7 = vcmp.ge.s32.totalorder %v604_v29, %v2462_v43  ;;  %vm736_vm3 = vcmp.lt.s32.totalorder %v604_v29, %v2483_v52  ;;  %v576_v29 = vadd.s32 232, %v2473_v47 }
  0x59   :  { %2097 = vmatpush3.bf16.msk.msra.mxu0 %vm3698_vm5, %v3734_v51  ;;  %vm2971_vm10 = vmand %vm652_vm6, %vm717_vm11  ;;  %vm735_vm11 = vcmp.lt.s32.totalorder %v603_v25, %v2483_v52 }
  0x5a   :  { %v3865_v27 = vsel %vm2971_vm10, 4294967295, %v3864_v27  ;;  %vm2978_vm13 = vmand %vm653_vm0, %vm718_vm9  ;;  %vm670_vm0 = vcmp.ge.s32.totalorder %v603_v25, %v2462_v43  ;;  %v3896_v25 = vmov 0 }
  0x5b   :  { %v3867_v30 = vsel %vm2978_vm13, 4294967295, %v3866_v30  ;;  %vm3701_vm6 = vmpackc.low %vm2978_vm13, %vm2971_vm10  ;;  %vm623_vm10 = vcmp.ge.s32.totalorder %v556_v33, %v2462_v43  ;;  %vm688_vm13 = vcmp.lt.s32.totalorder %v556_v33, %v2483_v52  ;;  %v607_v33 = vadd.s32 480, %v2473_v47 }
  0x5c   :  { %2129 = vmatpush3.bf16.msk.msra.mxu1 %vm3701_vm6, %v3734_v51  ;;  %vm2995_vm9 = vmand %vm638_vm8, %vm703_vm2  ;;  %vm687_vm2 = vcmp.lt.s32.totalorder %v555_v31, %v2483_v52 }
  0x5d   :  { %v3869_v32 = vsel %vm2995_vm9, 4294967295, %v3868_v32  ;;  %vm3002_vm5 = vmand %vm639_vm4, %vm704_vm15  ;;  %vm622_vm4 = vcmp.ge.s32.totalorder %v555_v31, %v2462_v43  ;;  %v3899_v31 = vmov 0 }
  0x5e   :  { %v3871_v35 = vsel %vm3002_vm5, 4294967295, %v3870_v35  ;;  %vm3704_vm8 = vmpackc.low %vm3002_vm5, %vm2995_vm9  ;;  %vm655_vm9 = vcmp.ge.s32.totalorder %v588_v40, %v2462_v43  ;;  %vm720_vm5 = vcmp.lt.s32.totalorder %v588_v40, %v2483_v52  ;;  %v608_v40 = vadd.s32 488, %v2473_v47 }
  0x5f   :  { %2099 = vmatprep.subr.msk.bf16.mxu0 %vm3704_vm8, %v3734_v51  ;;  %vm3019_vm15 = vmand %vm670_vm0, %vm735_vm11  ;;  %vm719_vm11 = vcmp.lt.s32.totalorder %v587_v38, %v2483_v52 }
  0x60   :  { %v3873_v39 = vsel %vm3019_vm15, 4294967295, %v3872_v39  ;;  %vm3026_vm6 = vmand %vm671_vm7, %vm736_vm3  ;;  %vm654_vm7 = vcmp.ge.s32.totalorder %v587_v38, %v2462_v43  ;;  %v3902_v38 = vmov 0 }
  0x61   :  { %v3875_v42 = vsel %vm3026_vm6, 4294967295, %v3874_v42  ;;  %vm3707_vm0 = vmpackc.low %vm3026_vm6, %vm3019_vm15  ;;  %vm641_vm15 = vcmp.ge.s32.totalorder %v574_v49, %v2462_v43  ;;  %vm706_vm6 = vcmp.lt.s32.totalorder %v574_v49, %v2483_v52  ;;  %v559_v49 = vadd.s32 96, %v2473_v47 }
  0x62   :  { %2131 = vmatprep.subr.msk.bf16.mxu1 %vm3707_vm0, %v3734_v51  ;;  %vm3043_vm3 = vmand %vm622_vm4, %vm687_vm2  ;;  %vm705_vm2 = vcmp.lt.s32.totalorder %v573_v45, %v2483_v52 }
  0x63   :  { %v3877_v46 = vsel %vm3043_vm3, 4294967295, %v3876_v46  ;;  %vm3050_vm8 = vmand %vm623_vm10, %vm688_vm13  ;;  %vm640_vm10 = vcmp.ge.s32.totalorder %v573_v45, %v2462_v43  ;;  %v3905_v45 = vmov 0 }
  0x64   :  { %v3879_v53 = vsel %vm3050_vm8, 4294967295, %v3878_v53  ;;  %vm3710_vm4 = vmpackc.low %vm3050_vm8, %vm3043_vm3  ;;  %vm673_vm3 = vcmp.ge.s32.totalorder %v606_v59, %v2462_v43  ;;  %vm738_vm8 = vcmp.lt.s32.totalorder %v606_v59, %v2483_v52  ;;  %v560_v59 = vadd.s32 104, %v2473_v47 }
  0x65   :  { %2101 = vmatpush3.bf16.msk.msra.mxu0 %vm3710_vm4, %v3734_v51  ;;  %vm3067_vm13 = vmand %vm654_vm7, %vm719_vm11  ;;  %vm737_vm11 = vcmp.lt.s32.totalorder %v605_v55, %v2483_v52 }
  0x66   :  { %v3881_v57 = vsel %vm3067_vm13, 4294967295, %v3880_v57  ;;  %vm3074_vm0 = vmand %vm655_vm9, %vm720_vm5  ;;  %vm672_vm9 = vcmp.ge.s32.totalorder %v605_v55, %v2462_v43  ;;  %v3908_v55 = vmov 0 }
  0x67   :  { %v3883_v61 = vsel %vm3074_vm0, 4294967295, %v3882_v61  ;;  %vm3713_vm7 = vmpackc.low %vm3074_vm0, %vm3067_vm13  ;;  %vm625_vm13 = vcmp.ge.s32.totalorder %v558_v3, %v2462_v43  ;;  %vm690_vm0 = vcmp.lt.s32.totalorder %v558_v3, %v2483_v52  ;;  %v591_v3 = vadd.s32 352, %v2473_v47 }
  0x68   :  { %2133 = vmatpush3.bf16.msk.msra.mxu1 %vm3713_vm7, %v3734_v51  ;;  %vm3091_vm5 = vmand %vm640_vm10, %vm705_vm2  ;;  %vm689_vm2 = vcmp.lt.s32.totalorder %v557_v63, %v2483_v52 }
  0x69   :  { %v3885_v1 = vsel %vm3091_vm5, 4294967295, %v3884_v1  ;;  %vm3098_vm4 = vmand %vm641_vm15, %vm706_vm6  ;;  %vm624_vm15 = vcmp.ge.s32.totalorder %v557_v63, %v2462_v43  ;;  %v3911_v63 = vmov 0 }
  0x6a   :  { %3886 = vst [vmem:[#allocation2_spill] sm:$0xff] %v3885_v1  ;;  %v3888_v7 = vsel %vm3098_vm4, 4294967295, %v3887_v7  ;;  %vm3716_vm10 = vmpackc.low %vm3098_vm4, %vm3091_vm5  ;;  %vm657_vm5 = vcmp.ge.s32.totalorder %v590_v16, %v2462_v43  ;;  %vm722_vm4 = vcmp.lt.s32.totalorder %v590_v16, %v2483_v52  ;;  %v592_v16 = vadd.s32 360, %v2473_v47 }
  0x6b   :  { %3889 = vst [vmem:[#allocation3_spill] sm:$0xff] %v3888_v7  ;;  %2103 = vmatprep.subr.msk.bf16.mxu0 %vm3716_vm10, %v3734_v51  ;;  %vm3115_vm6 = vmand %vm672_vm9, %vm737_vm11  ;;  %vm721_vm11 = vcmp.lt.s32.totalorder %v589_v9, %v2483_v52 }
  0x6c   :  { %v3891_v12 = vsel %vm3115_vm6, 4294967295, %v3890_v12  ;;  %vm3122_vm7 = vmand %vm673_vm3, %vm738_vm8  ;;  %vm656_vm3 = vcmp.ge.s32.totalorder %v589_v9, %v2462_v43  ;;  %v3914_v9 = vmov 0 }
  0x6d   :  { %3892 = vst [vmem:[#allocation4_spill] sm:$0xff] %v3891_v12  ;;  %v3894_v19 = vsel %vm3122_vm7, 4294967295, %v3893_v19  ;;  %vm3719_vm9 = vmpackc.low %vm3122_vm7, %vm3115_vm6  ;;  %vm643_vm6 = vcmp.ge.s32.totalorder %v576_v29, %v2462_v43  ;;  %vm708_vm7 = vcmp.lt.s32.totalorder %v576_v29, %v2483_v52  ;;  %v3920_v29 = vmov 0 }
  0x6e   :  { %3895 = vst [vmem:[#allocation5_spill] sm:$0xff] %v3894_v19  ;;  %2135 = vmatprep.subr.msk.bf16.mxu1 %vm3719_vm9, %v3734_v51  ;;  %vm3139_vm8 = vmand %vm624_vm15, %vm689_vm2  ;;  %vm707_vm2 = vcmp.lt.s32.totalorder %v575_v22, %v2483_v52 }
  0x6f   :  { %v3897_v25 = vsel %vm3139_vm8, 4294967295, %v3896_v25  ;;  %vm3146_vm10 = vmand %vm625_vm13, %vm690_vm0  ;;  %vm642_vm13 = vcmp.ge.s32.totalorder %v575_v22, %v2462_v43  ;;  %v3917_v22 = vmov 0 }
  0x70   :  { %3898 = vst [vmem:[#allocation6_spill] sm:$0xff] %v3897_v25  ;;  %v3900_v31 = vsel %vm3146_vm10, 4294967295, %v3899_v31  ;;  %vm3722_vm15 = vmpackc.low %vm3146_vm10, %vm3139_vm8  ;;  %vm675_vm8 = vcmp.ge.s32.totalorder %v608_v40, %v2462_v43  ;;  %vm740_vm10 = vcmp.lt.s32.totalorder %v608_v40, %v2483_v52  ;;  %v3926_v40 = vmov 0 }
  0x71   :  { %3901 = vst [vmem:[#allocation7_spill] sm:$0xff] %v3900_v31  ;;  %2105 = vmatpush3.bf16.msk.msra.mxu0 %vm3722_vm15, %v3734_v51  ;;  %vm3163_vm0 = vmand %vm656_vm3, %vm721_vm11  ;;  %vm739_vm11 = vcmp.lt.s32.totalorder %v607_v33, %v2483_v52 }
  0x72   :  { %v3903_v38 = vsel %vm3163_vm0, 4294967295, %v3902_v38  ;;  %vm3170_vm9 = vmand %vm657_vm5, %vm722_vm4  ;;  %vm674_vm5 = vcmp.ge.s32.totalorder %v607_v33, %v2462_v43  ;;  %v3923_v33 = vmov 0 }
  0x73   :  { %3904 = vst [vmem:[#allocation8_spill] sm:$0xff] %v3903_v38  ;;  %v3906_v45 = vsel %vm3170_vm9, 4294967295, %v3905_v45  ;;  %vm3725_vm3 = vmpackc.low %vm3170_vm9, %vm3163_vm0  ;;  %vm627_vm0 = vcmp.ge.s32.totalorder %v560_v59, %v2462_v43  ;;  %vm692_vm9 = vcmp.lt.s32.totalorder %v560_v59, %v2483_v52  ;;  %v577_v59 = vadd.s32 240, %v2473_v47 }
  0x74   :  { %3907 = vst [vmem:[#allocation9_spill] sm:$0xff] %v3906_v45  ;;  %2137 = vmatpush3.bf16.msk.msra.mxu1 %vm3725_vm3, %v3734_v51  ;;  %vm3187_vm4 = vmand %vm642_vm13, %vm707_vm2  ;;  %vm691_vm2 = vcmp.lt.s32.totalorder %v559_v49, %v2483_v52 }
  0x75   :  { %v3909_v55 = vsel %vm3187_vm4, 4294967295, %v3908_v55  ;;  %vm3194_vm15 = vmand %vm643_vm6, %vm708_vm7  ;;  %vm626_vm6 = vcmp.ge.s32.totalorder %v559_v49, %v2462_v43  ;;  %v3929_v49 = vmov 0 }
  0x76   :  { %3910 = vst [vmem:[#allocation10_spill] sm:$0xff] %v3909_v55  ;;  %v3912_v63 = vsel %vm3194_vm15, 4294967295, %v3911_v63  ;;  %vm3728_vm13 = vmpackc.low %vm3194_vm15, %vm3187_vm4  ;;  %vm659_vm4 = vcmp.ge.s32.totalorder %v592_v16, %v2462_v43  ;;  %vm724_vm15 = vcmp.lt.s32.totalorder %v592_v16, %v2483_v52  ;;  %v609_v16 = vadd.s32 496, %v2473_v47 }
  0x77   :  { %3913 = vst [vmem:[#allocation11_spill] sm:$0xff] %v3912_v63  ;;  %2107 = vmatprep.subr.msk.bf16.mxu0 %vm3728_vm13, %v3734_v51  ;;  %vm3211_vm7 = vmand %vm674_vm5, %vm739_vm11  ;;  %vm723_vm11 = vcmp.lt.s32.totalorder %v591_v3, %v2483_v52 }
  0x78   :  { %v3915_v9 = vsel %vm3211_vm7, 4294967295, %v3914_v9  ;;  %vm3218_vm3 = vmand %vm675_vm8, %vm740_vm10  ;;  %vm658_vm8 = vcmp.ge.s32.totalorder %v591_v3, %v2462_v43  ;;  %v578_v3 = vadd.s32 248, %v2473_v47 }
  0x79   :  { %3916 = vst [vmem:[#allocation12_spill] sm:$0xff] %v3915_v9  ;;  %v3918_v22 = vsel %vm3218_vm3, 4294967295, %v3917_v22  ;;  %vm3737_vm5 = vmpackc.low %vm3218_vm3, %vm3211_vm7  ;;  %v3942_v9 = vmov 0 }
  0x7a   :  { %3919 = vst [vmem:[#allocation13_spill] sm:$0xff] %v3918_v22  ;;  %2139 = vmatprep.subr.msk.bf16.mxu1 %vm3737_vm5, %v3734_v51  ;;  %vm3234_vm10 = vmand %vm626_vm6, %vm691_vm2  ;;  %vm741_vm5 = vcmp.lt.s32.totalorder %v609_v16, %v2483_v52 }
  0x7b   :  { %v3921_v29 = vsel %vm3234_vm10, 4294967295, %v3920_v29  ;;  %vm3240_vm13 = vmand %vm627_vm0, %vm692_vm9 }
  0x7c   :  { %3922 = vst [vmem:[#allocation14_spill] sm:$0xff] %v3921_v29  ;;  %v3924_v33 = vsel %vm3240_vm13, 4294967295, %v3923_v33  ;;  %vm3733_vm6 = vmpackc.low %vm3240_vm13, %vm3234_vm10  ;;  %v610_v29 = vadd.s32 504, %v2473_v47 }
  0x7d   :  { %3925 = vst [vmem:[#allocation15_spill] sm:$0xff] %v3924_v33  ;;  %2109 = vmatpush3.bf16.msk.msra.mxu0 %vm3733_vm6, %v3734_v51  ;;  %vm3256_vm9 = vmand %vm658_vm8, %vm723_vm11  ;;  %vm709_vm8 = vcmp.lt.s32.totalorder %v577_v59, %v2483_v52  ;;  %vm710_vm11 = vcmp.lt.s32.totalorder %v578_v3, %v2483_v52  ;;  %v3935_v33 = vmov 0 }
  0x7e   :  { %v3927_v40 = vsel %vm3256_vm9, 4294967295, %v3926_v40  ;;  %vm3260_vm0 = vmand %vm659_vm4, %vm724_vm15  ;;  %vm644_vm15 = vcmp.ge.s32.totalorder %v577_v59, %v2462_v43  ;;  %vm645_vm4 = vcmp.ge.s32.totalorder %v578_v3, %v2462_v43  ;;  %vm742_vm10 = vcmp.lt.s32.totalorder %v610_v29, %v2483_v52  ;;  %v4036_v28 = vld [vmem:[#allocation11_spill] sm:$0xff] }
  0x7f   :  { %3928 = vst [vmem:[#allocation16_spill] sm:$0xff] %v3927_v40  ;;  %v3930_v49 = vsel %vm3260_vm0, 4294967295, %v3929_v49  ;;  %vm3736_vm2 = vmpackc.low %vm3260_vm0, %vm3256_vm9  ;;  %v561_v40 = vadd.s32 112, %v2473_v47  ;;  %vm677_vm0 = vcmp.ge.s32.totalorder %v610_v29, %v2462_v43  ;;  %v593_v59 = vadd.s32 368, %v2473_v47 }
  0x80   :  { %3931 = vst [vmem:[#allocation17_spill] sm:$0xff] %v3930_v49  ;;  %2141 = vmatpush3.bf16.msk.msra.mxu1 %vm3736_vm2, %v3734_v51  ;;  %vm3283_vm6 = vmand %vm644_vm15, %vm709_vm8  ;;  %v3932_v51 = vmov 0  ;;  %vm676_vm2 = vcmp.ge.s32.totalorder %v609_v16, %v2462_v43  ;;  %v562_v49 = vadd.s32 120, %v2473_v47  ;;  %v3938_v3 = vmov 1.0|1.0  }
  0x81   :  { %v3933_v51 = vsel %vm3283_vm6, 4294967295, %v3932_v51  ;;  %vm3290_vm9 = vmand %vm645_vm4, %vm710_vm11  ;;  %v3939_v16 = vmov 0  ;;  %vm628_vm8 = vcmp.ge.s32.totalorder %v561_v40, %v2462_v43  ;;  %vm693_vm11 = vcmp.lt.s32.totalorder %v561_v40, %v2483_v52 }
  0x82   :  { %3934 = vst [vmem:[#allocation18_spill] sm:$0xff] %v3933_v51  ;;  %v3936_v33 = vsel %vm3290_vm9, 4294967295, %v3935_v33  ;;  %vm3747_vm15 = vmpackc.low %vm3290_vm9, %vm3283_vm6  ;;  %v594_v29 = vadd.s32 376, %v2473_v47  ;;  %vm629_vm7 = vcmp.ge.s32.totalorder %v562_v49, %v2462_v43  ;;  %vm694_vm3 = vcmp.lt.s32.totalorder %v562_v49, %v2483_v52 }
  0x83   :  { %3937 = vst [vmem:[#allocation19_spill] sm:$0xff] %v3936_v33  ;;  %2111 = vmatprep.subr.msk.bf16.mxu0 %vm3747_vm15, %v3938_v3  ;;  %vm3307_vm4 = vmand %vm676_vm2, %vm741_vm5  ;;  %v3945_v40 = vmov 0  ;;  %vm725_vm2 = vcmp.lt.s32.totalorder %v593_v59, %v2483_v52  ;;  %v3948_v49 = vmov 0 }
  0x84   :  { %v3940_v16 = vsel %vm3307_vm4, 4294967295, %v3939_v16  ;;  %vm3314_vm13 = vmand %vm677_vm0, %vm742_vm10  ;;  %vm660_vm0 = vcmp.ge.s32.totalorder %v593_v59, %v2462_v43  ;;  %vm661_vm6 = vcmp.ge.s32.totalorder %v594_v29, %v2462_v43  ;;  %vm726_vm9 = vcmp.lt.s32.totalorder %v594_v29, %v2483_v52  ;;  %v3374_v29 = vld [vmem:[%s3656_s2] sm:$0x77] }
  0x85   :  { %3941 = vst [vmem:[#allocation20_spill] sm:$0xff] %v3940_v16  ;;  %v3943_v9 = vsel %vm3314_vm13, 4294967295, %v3942_v9  ;;  %vm3775_vm5 = vmpackc.low %vm3314_vm13, %vm3307_vm4  ;;  %v3951_v59 = vmov 0  ;;  %v3954_v43 = vmov 0  ;;  %v89_v52 = vsub.s32 4, %v2473_v47 }
  0x86   :  { %3944 = vst [vmem:[#allocation21_spill] sm:$0xff] %v3943_v9  ;;  %2143 = vmatprep.subr.msk.bf16.mxu1 %vm3775_vm5, %v3938_v3  ;;  %vm3330_vm10 = vmand %vm628_vm8, %vm693_vm11 }
  0x87   :  { %v3946_v40 = vsel %vm3330_vm10, 4294967295, %v3945_v40  ;;  %vm3336_vm15 = vmand %vm629_vm7, %vm694_vm3  ;;  %3957 = vst [vmem:[#allocation26_spill] sm:$0xff] %v3374_v29  ;;  %v4051_v50 = vld [vmem:[#allocation17_spill] sm:$0xff] }
  0x88   :  { %3947 = vst [vmem:[#allocation22_spill] sm:$0xff] %v3946_v40  ;;  %v3949_v49 = vsel %vm3336_vm15, 4294967295, %v3948_v49  ;;  %vm3774_vm8 = vmpackc.low %vm3336_vm15, %vm3330_vm10  ;;  %v85_v40 = vsub.s32 0, %v2473_v47 }
  0x89   :  { %3950 = vst [vmem:[#allocation23_spill] sm:$0xff] %v3949_v49  ;;  %2113 = vmatpush3.bf16.msk.msra.mxu0 %vm3774_vm8, %v3938_v3  ;;  %vm3352_vm3 = vmand %vm660_vm0, %vm725_vm2  ;;  %v3380_v49 = vld [vmem:[%s3656_s2 + $0x8] sm:$0x77] }
  0x8a   :  { %v3952_v59 = vsel %vm3352_vm3, 4294967295, %v3951_v59  ;;  %vm3356_vm7 = vmand %vm661_vm6, %vm726_vm9  ;;  %3958 = vst [vmem:[#allocation27_spill] sm:$0xff] %v3380_v49  ;;  %v86_v16 = vrot.slane %v3374_v29, %v85_v40  ;;  %v94_v9 = vrot.slane %v3380_v49, %v85_v40  ;;  %v4056_v56 = vld [vmem:[#allocation19_spill] sm:$0xff] }
  0x8b   :  { %3953 = vst [vmem:[#allocation24_spill] sm:$0xff] %v3952_v59  ;;  %v3955_v43 = vsel %vm3356_vm7, 4294967295, %v3954_v43  ;;  %vm3773_vm11 = vmpackc.low %vm3356_vm7, %vm3352_vm3  ;;  %v98_v59 = vrot.slane %v3380_v49, %v89_v52  ;;  %vm1105_vm7 = vcmask 1043456  }
  0x8c   :  { %3956 = vst [vmem:[#allocation25_spill] sm:$0xff] %v3955_v43  ;;  %2145 = vmatpush3.bf16.msk.msra.mxu1 %vm3773_vm11, %v3938_v3  ;;  %v90_v43 = vrot.slane %v3374_v29, %v89_v52  ;;  %v106_v22 = vrot.slane %v86_v16, %v85_v40  ;;  %v114_v55 = vrot.slane %v94_v9, %v85_v40 }
  0x8d   :  { %v118_v33 = vrot.slane %v98_v59, %v85_v40 }
  0x8e   :  { %v110_v51 = vrot.slane %v90_v43, %v85_v40 }
 0x115   :  { %v498_v63 = vpop.f32.mrb[0].mxu0  ;;  %v539_v38 = vpop.f32.mrb[0].mxu1 }
 0x116   :  { %v500_v45 = vpop.f32.mrb[1].mxu0  ;;  %v541_v25 = vpop.f32.mrb[1].mxu1  ;;  %v3390_v7 = vadd.f32 %v498_v63, %v106_v22  ;;  %v3392_v52 = vadd.f32 %v539_v38, %v114_v55  ;;  %v936_v38 = vadd.s32 256, %v2450_v37 }
 0x117   :  { %v3386_v31 = vadd.f32 %v500_v45, %v110_v51  ;;  %v3388_v12 = vadd.f32 %v541_v25, %v118_v33  ;;  %v502_v19 = vpop.f32.mrb[2].mxu0  ;;  %v543_v1 = vpop.f32.mrb[2].mxu1  ;;  %v938_v51 = vmul.u32 128, %v2473_v47  ;;  %v935_v25 = vadd.s32 128, %v2450_v37 }
 0x118   :  { %v503_v29 = vpop.f32.mrb[3].mxu0  ;;  %v544_v49 = vpop.f32.mrb[3].mxu1  ;;  %v937_v1 = vadd.s32 384, %v2450_v37  ;;  %v2320_v45 = vmov 0.0  }
 0x119   :  { %1024 = vmatprep.mubr.f32.mxu0 %v3386_v31  ;;  %1094 = vmatprep.mubr.f32.mxu1 %v3388_v12  ;;  %v943_v19 = vadd.s32 128, %v938_v51  ;;  %vm940_vm6 = vcmp.ge.s32.totalorder %v935_v25, %v938_v51  ;;  %vm939_vm8 = vcmp.ge.s32.totalorder %v2450_v37, %v938_v51  ;;  %vm941_vm3 = vcmp.ge.s32.totalorder %v936_v38, %v938_v51 }
 0x11a   :  { %1025 = vmatmul.mubr.f32.vlgmr.msra.gmra.mrb[4].mxu0 %v3390_v7  ;;  %1095 = vmatmul.mubr.f32.vlgmr.msra.gmra.mrb[4].mxu1 %v3392_v52  ;;  %vm942_vm0 = vcmp.ge.s32.totalorder %v937_v1, %v938_v51 }
 0x11b   :  { %vm945_vm9 = vcmp.lt.s32.totalorder %v935_v25, %v943_v19  ;;  %vm947_vm2 = vcmp.lt.s32.totalorder %v937_v1, %v943_v19  ;;  %vm944_vm5 = vcmp.lt.s32.totalorder %v2450_v37, %v943_v19  ;;  %vm946_vm15 = vcmp.lt.s32.totalorder %v936_v38, %v943_v19  ;;  %1182 = vmatprep.mubr.f32.mxu0 %v2320_v45 }
 0x11c   :  { %vm949_vm11 = vmand %vm940_vm6, %vm945_vm9  ;;  %1253 = vmatprep.mubr.f32.mxu1 %v2320_v45 }
 0x11d   :  { %v1799_v55 = vsel %vm949_vm11, 1.0, %v2320_v45  ;;  %vm951_vm10 = vmand %vm942_vm0, %vm947_vm2  ;;  %vm3959_vm11 = vnez %v3783_v6  ;;  %vm1101_vm0 = vcmask 31744   ;;  %vm3965_vm2 = vnez %v3791_v17  ;;  %v4026_v17 = vld [vmem:[#allocation7_spill] sm:$0xff] }
 0x11e   :  { %1866 = vmatprep.subr.msk.mxu0 %vm1105_vm7, %v1799_v55  ;;  %v1801_v63 = vsel %vm951_vm10, 1.0, %v2320_v45  ;;  %vm948_vm6 = vmand %vm939_vm8, %vm944_vm5  ;;  %vm3960_vm5 = vnez %v3781_v4  ;;  %vm3962_vm8 = vnez %v3787_v14  ;;  %v4016_v4 = vld [vmem:[#allocation3_spill] sm:$0xff]  ;;  %v4021_v14 = vld [vmem:[#allocation5_spill] sm:$0xff] }
 0x11f   :  { %1869 = vmatprep.subr.msk.mxu1 %vm1105_vm7, %v1801_v63  ;;  %v3411_v37 = vsel %vm948_vm6, 1.0, %v2320_v45  ;;  %vm950_vm9 = vmand %vm941_vm3, %vm946_vm15  ;;  %vm3963_vm15 = vnez %v3785_v10  ;;  %vm3966_vm6 = vnez %v3789_v15  ;;  %v4018_v10 = vld [vmem:[#allocation2_spill] sm:$0xff]  ;;  %v4023_v15 = vld [vmem:[#allocation4_spill] sm:$0xff] }
 0x120   :  { %1867 = vmatpush1.msk.msra.mxu0 %vm1105_vm7, %v3411_v37  ;;  %v3416_v9 = vsel %vm950_vm9, 1.0, %v2320_v45  ;;  %vm3961_vm10 = vmpackc.low %vm3959_vm11, %vm3960_vm5  ;;  %vm3968_vm11 = vnez %v3795_v24  ;;  %vm3969_vm5 = vnez %v3793_v21  ;;  %v4028_v21 = vld [vmem:[#allocation6_spill] sm:$0xff]  ;;  %v4031_v24 = vld [vmem:[#allocation9_spill] sm:$0xff] }
 0x121   :  { %1870 = vmatpush1.msk.msra.mxu1 %vm1105_vm7, %v3416_v9  ;;  %2147 = vmatprep.subr.msk.bf16.mxu0 %vm3961_vm10, %v3938_v3  ;;  %vm3964_vm3 = vmpackc.low %vm3962_vm8, %vm3963_vm15  ;;  %vm3971_vm8 = vnez %v3797_v26  ;;  %v4033_v26 = vld [vmem:[#allocation8_spill] sm:$0xff] }
 0x122   :  { %2179 = vmatprep.subr.msk.bf16.mxu1 %vm3964_vm3, %v3938_v3  ;;  %vm3967_vm9 = vmpackc.low %vm3965_vm2, %vm3966_vm6  ;;  %vm3973_vm3 = vnez %v3806_v36  ;;  %vm3974_vm2 = vnez %v3802_v34  ;;  %v4038_v34 = vld [vmem:[#allocation10_spill] sm:$0xff]  ;;  %v4041_v36 = vld [vmem:[#allocation13_spill] sm:$0xff] }
 0x123   :  { %vm3970_vm10 = vmpackc.low %vm3968_vm11, %vm3969_vm5  ;;  %vm3977_vm11 = vnez %v3808_v41  ;;  %v4043_v41 = vld [vmem:[#allocation12_spill] sm:$0xff] }
 0x124   :  { %vm3972_vm15 = vmpackc.low %vm2650_vm14, %vm3971_vm8  ;;  %vm3979_vm14 = vnez %v3812_v48  ;;  %vm3981_vm8 = vnez %v3819_v54  ;;  %v4048_v48 = vld [vmem:[#allocation14_spill] sm:$0xff]  ;;  %v4053_v54 = vld [vmem:[#allocation16_spill] sm:$0xff] }
 0x125   :  { %vm3975_vm6 = vmpackc.low %vm3973_vm3, %vm3974_vm2  ;;  %vm3983_vm3 = vnez %v3835_v60  ;;  %vm3984_vm2 = vnez %v3833_v58  ;;  %v4058_v58 = vld [vmem:[#allocation18_spill] sm:$0xff] }
 0x1ed   :  { %v1974_v22 = vpop.f32.mrb[4].mxu0  ;;  %v2009_v33 = vpop.f32.mrb[4].mxu1 }
 0x1ee   :  { %v1975_v16 = vpop.f32.mrb[5].mxu0  ;;  %v2010_v40 = vpop.f32.mrb[5].mxu1 }
 0x1ef   :  { %v1976_v49 = vadd.f32 %v1975_v16, %v1974_v22  ;;  %v2011_v59 = vadd.f32 %v2010_v40, %v2009_v33  ;;  %v4074_v22 = vld [vmem:[#allocation26_spill] sm:$0xff]  ;;  %v1608_v16 = vsub.s32 6, %v2473_v47  ;;  %v4075_v40 = vld [vmem:[#allocation27_spill] sm:$0xff] }
 0x1f1   :  { %v1097_v43 = vadd.f32 %v2011_v59, %v1976_v49 }
 0x1f3   :  { %v1100_v6 = vmul.f32 0.0078125, %v1097_v43 }
 0x1f5   :  { %1868 = vmatmul.mubr.msk.f32.vlgmr.msra.gmra.mrb[6].mxu0 %vm1101_vm0, %v1100_v6  ;;  %1871 = vmatmul.mubr.msk.f32.vlgmr.msra.gmra.mrb[6].mxu1 %vm1101_vm0, %v1100_v6 }
 0x1f6   :  { %2149 = vmatpush3.bf16.msk.msra.mxu0 %vm3967_vm9, %v3938_v3  ;;  %2181 = vmatpush3.bf16.msk.msra.mxu1 %vm3970_vm10, %v3938_v3  ;;  %vm3976_vm9 = vnez %v3810_v44  ;;  %vm3980_vm10 = vmpackc.low %vm2744_vm1, %vm3979_vm14  ;;  %vm3987_vm1 = vnez %v3841_v62  ;;  %v4046_v44 = vld [vmem:[#allocation15_spill] sm:$0xff] }
 0x1f7   :  { %2151 = vmatprep.subr.msk.bf16.mxu0 %vm3972_vm15, %v3938_v3  ;;  %2183 = vmatprep.subr.msk.bf16.mxu1 %vm3975_vm6, %v3938_v3  ;;  %vm3978_vm5 = vmpackc.low %vm3976_vm9, %vm3977_vm11  ;;  %vm3986_vm9 = vnez %v3847_v0  ;;  %v4064_v0 = vld [vmem:[#allocation23_spill] sm:$0xff] }
 0x1f8   :  { %vm3982_vm15 = vmpackc.low %vm3842_vm12, %vm3981_vm8  ;;  %vm3990_vm12 = vnez %v3849_v2  ;;  %vm3993_vm8 = vnez %v3853_v8  ;;  %v4066_v2 = vld [vmem:[#allocation22_spill] sm:$0xff]  ;;  %v4071_v8 = vld [vmem:[#allocation24_spill] sm:$0xff] }
 0x1f9   :  { %vm3985_vm6 = vmpackc.low %vm3983_vm3, %vm3984_vm2  ;;  %vm3995_vm3 = vnez %v3859_v18  ;;  %vm3996_vm2 = vnez %v3857_v13 }
 0x1fa   :  { %2153 = vmatpush3.bf16.msk.msra.mxu0 %vm3978_vm5, %v3938_v3  ;;  %2185 = vmatpush3.bf16.msk.msra.mxu1 %vm3980_vm10, %v3938_v3  ;;  %vm3988_vm11 = vmpackc.low %vm3986_vm9, %vm3987_vm1  ;;  %vm3989_vm5 = vnez %v3851_v5  ;;  %vm3992_vm10 = vnez %v3855_v11  ;;  %vm3998_vm9 = vnez %v3863_v23  ;;  %vm3999_vm1 = vnez %v3861_v20  ;;  %v4069_v5 = vld [vmem:[#allocation25_spill] sm:$0xff] }
 0x1fb   :  { %2155 = vmatprep.subr.msk.bf16.mxu0 %vm3982_vm15, %v3938_v3  ;;  %2187 = vmatprep.subr.msk.bf16.mxu1 %vm3985_vm6, %v3938_v3  ;;  %vm3991_vm14 = vmpackc.low %vm3989_vm5, %vm3990_vm12  ;;  %vm4001_vm5 = vnez %v3867_v30  ;;  %vm4002_vm12 = vnez %v3865_v27 }
 0x1fc   :  { %vm3994_vm15 = vmpackc.low %vm3992_vm10, %vm3993_vm8  ;;  %vm4004_vm10 = vnez %v3871_v35  ;;  %vm4005_vm8 = vnez %v3869_v32 }
 0x1fd   :  { %vm3997_vm6 = vmpackc.low %vm3995_vm3, %vm3996_vm2  ;;  %vm4007_vm3 = vnez %v3875_v42  ;;  %vm4008_vm2 = vnez %v3873_v39 }
 0x1fe   :  { %2157 = vmatpush3.bf16.msk.msra.mxu0 %vm3988_vm11, %v3938_v3  ;;  %2189 = vmatpush3.bf16.msk.msra.mxu1 %vm3991_vm14, %v3938_v3  ;;  %vm4000_vm11 = vmpackc.low %vm3998_vm9, %vm3999_vm1  ;;  %vm4010_vm9 = vnez %v3879_v53  ;;  %vm4011_vm1 = vnez %v3877_v46 }
 0x1ff   :  { %2159 = vmatprep.subr.msk.bf16.mxu0 %vm3994_vm15, %v3938_v3  ;;  %2191 = vmatprep.subr.msk.bf16.mxu1 %vm3997_vm6, %v3938_v3  ;;  %vm4003_vm14 = vmpackc.low %vm4001_vm5, %vm4002_vm12  ;;  %vm4013_vm5 = vnez %v3883_v61  ;;  %vm4014_vm12 = vnez %v3881_v57 }
 0x200   :  { %vm4006_vm15 = vmpackc.low %vm4004_vm10, %vm4005_vm8  ;;  %vm4017_vm10 = vnez %v4016_v4  ;;  %vm4019_vm8 = vnez %v4018_v10 }
 0x201   :  { %vm4009_vm6 = vmpackc.low %vm4007_vm3, %vm4008_vm2  ;;  %vm4022_vm3 = vnez %v4021_v14  ;;  %vm4024_vm2 = vnez %v4023_v15  ;;  %v1609_v14 = vrot.slane %v4074_v22, %v1608_v16  ;;  %v2321_v15 = vmov 1983009808  }
 0x202   :  { %2161 = vmatpush3.bf16.msk.msra.mxu0 %vm4000_vm11, %v3938_v3  ;;  %2193 = vmatpush3.bf16.msk.msra.mxu1 %vm4003_vm14, %v3938_v3  ;;  %vm4012_vm11 = vmpackc.low %vm4010_vm9, %vm4011_vm1  ;;  %vm4027_vm9 = vnez %v4026_v17  ;;  %vm4029_vm1 = vnez %v4028_v21  ;;  %v1649_v17 = vunpack.c.l.s4 %v2321_v15 }
 0x203   :  { %2163 = vmatprep.subr.msk.bf16.mxu0 %vm4006_vm15, %v3938_v3  ;;  %2195 = vmatprep.subr.msk.bf16.mxu1 %vm4009_vm6, %v3938_v3  ;;  %vm4015_vm14 = vmpackc.low %vm4013_vm5, %vm4014_vm12  ;;  %vm4032_vm5 = vnez %v4031_v24  ;;  %vm4034_vm12 = vnez %v4033_v26  ;;  %v1617_v26 = vrot.slane %v4075_v40, %v1608_v16 }
 0x204   :  { %vm4020_vm15 = vmpackc.low %vm4017_vm10, %vm4019_vm8  ;;  %vm4037_vm10 = vnez %v4036_v28  ;;  %vm4039_vm8 = vnez %v4038_v34 }
 0x205   :  { %vm4025_vm6 = vmpackc.low %vm4022_vm3, %vm4024_vm2  ;;  %vm4042_vm3 = vnez %v4041_v36  ;;  %vm4044_vm2 = vnez %v4043_v41 }
 0x206   :  { %2165 = vmatpush3.bf16.msk.msra.mxu0 %vm4012_vm11, %v3938_v3  ;;  %2197 = vmatpush3.bf16.msk.msra.mxu1 %vm4015_vm14, %v3938_v3  ;;  %vm4030_vm11 = vmpackc.low %vm4027_vm9, %vm4029_vm1  ;;  %vm4047_vm9 = vnez %v4046_v44  ;;  %vm4049_vm1 = vnez %v4048_v48 }
 0x207   :  { %2167 = vmatprep.subr.msk.bf16.mxu0 %vm4020_vm15, %v3938_v3  ;;  %2199 = vmatprep.subr.msk.bf16.mxu1 %vm4025_vm6, %v3938_v3  ;;  %vm4035_vm14 = vmpackc.low %vm4032_vm5, %vm4034_vm12  ;;  %vm4052_vm5 = vnez %v4051_v50  ;;  %vm4054_vm12 = vnez %v4053_v54 }
 0x208   :  { %vm4040_vm15 = vmpackc.low %vm4037_vm10, %vm4039_vm8  ;;  %vm4057_vm10 = vnez %v4056_v56  ;;  %vm4059_vm8 = vnez %v4058_v58 }
 0x209   :  { %vm4045_vm6 = vmpackc.low %vm4042_vm3, %vm4044_vm2  ;;  %vm4065_vm2 = vnez %v4064_v0  ;;  %v1650_v0 = vunpack.c.0.s8 %v1649_v17 }
 0x20a   :  { %2169 = vmatpush3.bf16.msk.msra.mxu0 %vm4030_vm11, %v3938_v3  ;;  %2201 = vmatpush3.bf16.msk.msra.mxu1 %vm4035_vm14, %v3938_v3  ;;  %vm4050_vm11 = vmpackc.low %vm4047_vm9, %vm4049_vm1  ;;  %vm4070_vm1 = vnez %v4069_v5 }
 0x20b   :  { %2171 = vmatprep.subr.msk.bf16.mxu0 %vm4040_vm15, %v3938_v3  ;;  %2203 = vmatprep.subr.msk.bf16.mxu1 %vm4045_vm6, %v3938_v3  ;;  %vm4055_vm14 = vmpackc.low %vm4052_vm5, %vm4054_vm12  ;;  %vm4067_vm6 = vnez %v4066_v2 }
 0x20c   :  { %vm4060_vm15 = vmpackc.low %vm4057_vm10, %vm4059_vm8 }
 0x20d   :  { %vm4063_vm3 = vmpackc.low %vm3314_vm13, %vm3307_vm4 }
 0x20e   :  { %2173 = vmatpush3.bf16.msk.msra.mxu0 %vm4050_vm11, %v3938_v3  ;;  %2205 = vmatpush3.bf16.msk.msra.mxu1 %vm4055_vm14, %v3938_v3  ;;  %vm4068_vm9 = vmpackc.low %vm4065_vm2, %vm4067_vm6  ;;  %vm4072_vm11 = vnez %v4071_v8 }
 0x20f   :  { %2175 = vmatprep.subr.msk.bf16.mxu0 %vm4060_vm15, %v3938_v3  ;;  %2207 = vmatprep.subr.msk.bf16.mxu1 %vm4063_vm3, %v3938_v3  ;;  %vm4073_vm5 = vmpackc.low %vm4070_vm1, %vm4072_vm11 }
 0x212   :  { %2177 = vmatpush3.bf16.msk.msra.mxu0 %vm4068_vm9, %v3938_v3  ;;  %2209 = vmatpush3.bf16.msk.msra.mxu1 %vm4073_vm5, %v3938_v3 }
 0x213   :  { %1936 = vmatprep.subr.msk.mxu0 %vm1105_vm7, %v1799_v55  ;;  %1939 = vmatprep.subr.msk.mxu1 %vm1105_vm7, %v1801_v63  ;;  %v1564_v63 = vsub.s32 1, %v2473_v47 }
 0x215   :  { %v1565_v33 = vrot.slane %v4074_v22, %v1564_v63  ;;  %v1573_v49 = vrot.slane %v4075_v40, %v1564_v63 }
 0x217   :  { %v1585_v10 = vrot.slane %v1565_v33, %v1564_v63  ;;  %v1593_v24 = vrot.slane %v1573_v49, %v1564_v63 }
 0x2c8   :  { %v1184_v11 = vpop.f32.mrb[6].mxu0  ;;  %v1255_v13 = vpop.f32.mrb[6].mxu1 }
 0x2c9   :  { %v1260_v18 = vsub.f32 %v3390_v7, %v1184_v11  ;;  %v1262_v20 = vsub.f32 %v3392_v52, %v1255_v13  ;;  %v1186_v23 = vpop.f32.mrb[7].mxu0  ;;  %v1257_v27 = vpop.f32.mrb[7].mxu1 }
 0x2ca   :  { %v3619_v30 = vsub.f32 %v3386_v31, %v1186_v23  ;;  %v3622_v32 = vsub.f32 %v3388_v12, %v1257_v27 }
 0x2cb   :  { %v1264_v42 = vmul.f32 %v1260_v18, %v1260_v18  ;;  %v1266_v46 = vmul.f32 %v1262_v20, %v1262_v20 }
 0x2cc   :  { %v1265_v35 = vmul.f32 %v3619_v30, %v3619_v30  ;;  %v1267_v39 = vmul.f32 %v3622_v32, %v3622_v32 }
 0x2ce   :  { %1332 = vmatprep.mubr.f32.mxu0 %v1265_v35  ;;  %1402 = vmatprep.mubr.f32.mxu1 %v1267_v39  ;;  %v1653_v35 = vsub.s32 %v1650_v0, %v2473_v47 }
 0x2cf   :  { %1333 = vmatmul.mubr.f32.vlgmr.msra.gmra.mrb[8].mxu0 %v1264_v42  ;;  %1403 = vmatmul.mubr.f32.vlgmr.msra.gmra.mrb[8].mxu1 %v1266_v46 }
 0x2d0   :  { %1937 = vmatpush1.msk.msra.mxu0 %vm1105_vm7, %v3411_v37  ;;  %1940 = vmatpush1.msk.msra.mxu1 %vm1105_vm7, %v3416_v9  ;;  %v1604_v37 = vsub.s32 2, %v2473_v47  ;;  %v1568_v9 = vsub.s32 5, %v2473_v47 }
 0x2d1   :  { %1476 = vmatprep.mubr.f32.mxu0 %v2320_v45  ;;  %1547 = vmatprep.mubr.f32.mxu1 %v2320_v45 }
 0x2d2   :  { %v1605_v59 = vrot.slane %v4074_v22, %v1604_v37  ;;  %v1569_v43 = vrot.slane %v4074_v22, %v1568_v9  ;;  %v1613_v6 = vrot.slane %v4075_v40, %v1604_v37  ;;  %v1577_v4 = vrot.slane %v4075_v40, %v1568_v9 }
 0x2d3   :  { %v1629_v62 = vrot.slane %v1609_v14, %v1604_v37  ;;  %v1637_v8 = vrot.slane %v1617_v26, %v1604_v37 }
 0x2d4   :  { %v1625_v36 = vrot.slane %v1605_v59, %v1604_v37  ;;  %v1589_v41 = vrot.slane %v1569_v43, %v1564_v63  ;;  %v1633_v50 = vrot.slane %v1613_v6, %v1604_v37  ;;  %v1597_v54 = vrot.slane %v1577_v4, %v1564_v63 }
 0x3a2   :  { %v2044_v53 = vpop.f32.mrb[8].mxu0  ;;  %v2079_v57 = vpop.f32.mrb[8].mxu1 }
 0x3a3   :  { %v2045_v61 = vpop.f32.mrb[9].mxu0  ;;  %v2080_v7 = vpop.f32.mrb[9].mxu1 }
 0x3a4   :  { %v2046_v12 = vadd.f32 %v2045_v61, %v2044_v53  ;;  %v2081_v31 = vadd.f32 %v2080_v7, %v2079_v57 }
 0x3a6   :  { %v1405_v3 = vadd.f32 %v2081_v31, %v2046_v12 }
 0x3a8   :  { %v1408_v29 = vmul.f32 0.0078125, %v1405_v3 }
 0x3aa   :  { %1938 = vmatmul.mubr.msk.f32.vlgmr.msra.gmra.mrb[10].mxu0 %vm1101_vm0, %v1408_v29  ;;  %1941 = vmatmul.mubr.msk.f32.vlgmr.msra.gmra.mrb[10].mxu1 %vm1101_vm0, %v1408_v29 }
 0x47d   :  { %v1478_v52 = vpop.f32.mrb[10].mxu0  ;;  %v1549_v51 = vpop.f32.mrb[10].mxu1 }
 0x47e   :  { %v1479_v25 = vadd.f32 1e-05, %v1478_v52  ;;  %v1550_v19 = vadd.f32 1e-05, %v1549_v51  ;;  %v1480_v1 = vpop.f32.mrb[11].mxu0  ;;  %v1551_v38 = vpop.f32.mrb[11].mxu1 }
 0x47f   :  { %v1481_v55 = vadd.f32 1e-05, %v1480_v1  ;;  %v1552_v45 = vadd.f32 1e-05, %v1551_v38 }
 0x480   :  { %2310 = vrsqrt.f32 %v1479_v25 }
 0x481   :  { %2312 = vrsqrt.f32 %v1550_v19 }
 0x482   :  { %2314 = vrsqrt.f32 %v1481_v55 }
 0x483   :  { %2316 = vrsqrt.f32 %v1552_v45 }
 0x48a   :  { %v2311_v21 = vpop.eup %2310 }
 0x48b   :  { %v2313_v28 = vpop.eup %2312  ;;  %v1558_v34 = vmul.f32 %v2311_v21, %v1260_v18 }
 0x48c   :  { %v2315_v44 = vpop.eup %2314  ;;  %v1560_v48 = vmul.f32 %v2313_v28, %v1262_v20 }
 0x48d   :  { %v2317_v56 = vpop.eup %2316  ;;  %v1598_v58 = vmul.f32 %v1585_v10, %v1558_v34  ;;  %v1559_v60 = vmul.f32 %v2315_v44, %v3619_v30 }
 0x48e   :  { %v1600_v2 = vmul.f32 %v1593_v24, %v1560_v48  ;;  %v1561_v5 = vmul.f32 %v2317_v56, %v3622_v32 }
 0x48f   :  { %v1638_v11 = vadd.f32 %v1625_v36, %v1598_v58  ;;  %v1599_v13 = vmul.f32 %v1589_v41, %v1559_v60 }
 0x490   :  { %v1640_v23 = vadd.f32 %v1633_v50, %v1600_v2  ;;  %v1601_v18 = vmul.f32 %v1597_v54, %v1561_v5 }
 0x491   :  { %v1639_v27 = vadd.f32 %v1629_v62, %v1599_v13 }
 0x492   :  { %v1641_v20 = vadd.f32 %v1637_v8, %v1601_v18 }
 0x493   :  { %v1646_v39 = vcombine.low %v1638_v11, %v1639_v27 }
 0x494   :  { %v1647_v42 = vcombine.low %v1640_v23, %v1641_v20 }
 0x495   :  { %v1654_v46 = vrot.slane %v1646_v39, %v1653_v35 }
 0x496   :  { %v1661_v53 = vrot.slane %v1647_v42, %v1653_v35 }
 0x498   :  { %v1662_v57 = vcombine.low %v1654_v46, %v1661_v53 }
 0x49a   :  { %1664 = vst [vmem:[%s3657_s3] sm:$0xff] %v1662_v57 }

</bundles_post_ra>
